<compile_context>
chip_gen: v7x
topology: tpu7x:2x2x1
jax: 0.10.0
libtpu: 0.0.40
codegen_flags: <defaults>
</compile_context>

<pallas_src>
import functools

import jax
import jax.numpy as jnp
import numpy as np
from jax.experimental import pallas as pl
from jax.experimental.pallas import tpu as pltpu

BN_EPS = 1e-5
VMEM_LIMIT_BYTES = 32 * 1024 * 1024  # explicit; ample for these shapes on v5e/v6e/v7x


def _res_block_kernel(x_ref, bw1_ref, bw2_ref, g1_ref, b1_ref, g2_ref, b2_ref,
                      avg_ref, o_ref, pad_ref, slab_ref, *, n, h, w, c):
    wc = w * c
    nh = n * h

    def conv3x3(x3, bw_ref):
        # x3: (n, h, w*c) lane-dense rows of the conv input.
        # 1) Reflect-pad along H into the shared VMEM scratch (3 strided stores).
        pad_ref[:, 1:h + 1, :] = x3
        pad_ref[:, 0:1, :] = x3[:, 1:2, :]
        pad_ref[:, h + 1:h + 2, :] = x3[:, h - 2:h - 1, :]
        # 2) im2col slab: one lane-aligned (n*h, w*c) block per tap.  The W
        #    shift + reflection is done with intra-vreg lane slices + concat.
        for dy in range(3):
            rows = pad_ref[:, dy:dy + h, :]                      # (n, h, w*c)
            left = jnp.concatenate(                              # dx = 0
                [rows[:, :, c:2 * c], rows[:, :, :(w - 1) * c]], axis=2)
            right = jnp.concatenate(                             # dx = 2
                [rows[:, :, c:w * c], rows[:, :, (w - 2) * c:(w - 1) * c]],
                axis=2)
            for dx, patch in ((0, left), (1, rows), (2, right)):
                t = dy * 3 + dx
                slab_ref[:, t * wc:(t + 1) * wc] = patch.reshape(nh, wc)
        # 3) One fused MXU matmul per conv (K = 9*w*c).  The block-diagonal
        #    weight keeps the output lane-dense (w*c lanes).
        return jnp.dot(slab_ref[...], bw_ref[...],
                       preferred_element_type=jnp.float32)       # (n*h, w*c)

    def batchnorm(y, g_lane, b_lane):
        # BatchNorm2d(track_running_stats=False): biased batch stats over
        # (N, H, W) per channel, eps=1e-5, affine.  `avg_ref` pools the W
        # lane-groups of each channel and broadcasts back to every lane in a
        # single tiny matmul, so all elementwise math stays lane-dense.
        mean_lane = jnp.dot(jnp.sum(y, axis=0, keepdims=True), avg_ref[...])
        d = y - mean_lane
        var_lane = jnp.dot(jnp.sum(d * d, axis=0, keepdims=True), avg_ref[...])
        inv_lane = jax.lax.rsqrt(var_lane + BN_EPS)
        return d * (inv_lane * g_lane) + b_lane

    out = conv3x3(x_ref[...].reshape(n, h, wc), bw1_ref)          # s_conv1
    out = jnp.maximum(batchnorm(out, g1_ref[...], b1_ref[...]), 0.0)
    out = conv3x3(out.reshape(n, h, wc), bw2_ref)                 # conv2
    out = batchnorm(out, g2_ref[...], b2_ref[...])
    # Identity shortcut: re-read x here (not kept live across the convs); the
    # add and the final store are fully lane-dense.
    o_ref[...] = (out + x_ref[...]).astype(o_ref.dtype)


def _expand_conv_weight(w_oihw, w_spatial):
    """(Cout, Cin, 3, 3) torch layout -> block-diagonal (9*W*Cin, W*Cout)."""
    cout, cin = w_oihw.shape[0], w_oihw.shape[1]
    taps = jnp.transpose(w_oihw, (2, 3, 1, 0)).reshape(9, cin, cout)
    eye = jnp.eye(w_spatial, dtype=w_oihw.dtype)
    blocks = [jnp.kron(eye, taps[t]) for t in range(9)]           # (W*Cin, W*Cout)
    return jnp.concatenate(blocks, axis=0)


@jax.jit
def res_block_pallas(x_nhwc, w1, w2, g1, b1, g2, b2):
    """x_nhwc: (N, H, W, C); w1/w2: (C, C, 3, 3) torch layout; g/b: (C,)."""
    n, h, w, c = x_nhwc.shape
    assert w1.shape == (c, c, 3, 3) and w2.shape == (c, c, 3, 3), \
        "identity shortcut path requires inchannel == outchannel, 3x3 kernels"
    assert h >= 2 and w >= 2, "ReflectionPad2d(1) needs H, W >= 2"
    wc = w * c

    # Single-block VMEM ceiling (see TODO above for the tiled-grid version).
    vmem_bytes = 4 * (2 * n * h * wc            # x + out
                      + 2 * 9 * wc * wc         # expanded conv weights
                      + wc * wc                 # BN pooling matrix
                      + 4 * wc                  # gamma/beta (lane-tiled)
                      + n * (h + 2) * wc        # reflect-pad scratch
                      + n * h * 9 * wc)         # im2col slab scratch
    assert vmem_bytes < VMEM_LIMIT_BYTES // 2, \
        f"resBlock single-block kernel needs ~{vmem_bytes} B of VMEM; tile it."

    x2d = x_nhwc.reshape(n * h, wc)             # free: row-major compatible
    bw1 = _expand_conv_weight(w1, w)            # (9*W*C, W*C)
    bw2 = _expand_conv_weight(w2, w)

    # Per-channel pool-and-broadcast matrix for BN batch stats:
    # avg[l, l'] = 1/(N*H*W) if lane l and l' hold the same channel else 0.
    lane_ch = np.arange(wc) % c
    avg = jnp.asarray((lane_ch[:, None] == lane_ch[None, :]).astype(np.float32)
                      / float(n * h * w))

    # Lane-tiled affine params so the BN math never leaves the 128-lane layout.
    g1l = jnp.tile(g1.reshape(1, c), (1, w)).astype(jnp.float32)
    b1l = jnp.tile(b1.reshape(1, c), (1, w)).astype(jnp.float32)
    g2l = jnp.tile(g2.reshape(1, c), (1, w)).astype(jnp.float32)
    b2l = jnp.tile(b2.reshape(1, c), (1, w)).astype(jnp.float32)

    kernel = functools.partial(_res_block_kernel, n=n, h=h, w=w, c=c)
    vspec = pl.BlockSpec(memory_space=pltpu.MemorySpace.VMEM)
    out2d = pl.pallas_call(
        kernel,
        out_shape=jax.ShapeDtypeStruct((n * h, wc), x_nhwc.dtype),
        in_specs=[vspec] * 8,
        out_specs=vspec,
        scratch_shapes=[
            pltpu.VMEM((n, h + 2, wc), jnp.float32),   # H-reflect-padded rows
            pltpu.VMEM((n * h, 9 * wc), jnp.float32),  # im2col slab
        ],
        compiler_params=pltpu.CompilerParams(vmem_limit_bytes=VMEM_LIMIT_BYTES),
    )(x2d, bw1, bw2, g1l, b1l, g2l, b2l, avg)
    return out2d.reshape(n, h, w, c)


def res_block_ref(x, w1, w2, g1, b1, g2, b2):
    """Pure-JAX NHWC reference (mirrors the PyTorch forward)."""
    def rpad(a):
        return jnp.pad(a, ((0, 0), (1, 1), (1, 1), (0, 0)), mode="reflect")

    def conv(a, w_oihw):
        w_hwio = jnp.transpose(w_oihw, (2, 3, 1, 0))
        return jax.lax.conv_general_dilated(
            a, w_hwio, (1, 1), "VALID",
            dimension_numbers=("NHWC", "HWIO", "NHWC"))

    def bn(a, g, b):
        mean = a.mean(axis=(0, 1, 2), keepdims=True)
        var = ((a - mean) ** 2).mean(axis=(0, 1, 2), keepdims=True)
        return ((a - mean) / jnp.sqrt(var + BN_EPS)) * g.reshape(1, 1, 1, -1) \
            + b.reshape(1, 1, 1, -1)

    out = conv(rpad(x), w1)
    out = bn(out, g1, b1)
    out = jnp.maximum(out, 0.0)
    out = conv(rpad(out), w2)
    out = bn(out, g2, b2)
    return out + x


if __name__ == "__main__":
    # NHWC end-to-end (no NCHW<->NHWC transposes around the kernel).
    n, c, h, w = 2, 8, 16, 16          # W*C = 128 -> fully lane-dense
    key = jax.random.PRNGKey(0)
    kx, k1, k2, kg1, kb1, kg2, kb2 = jax.random.split(key, 7)

    x = jax.random.normal(kx, (n, h, w, c), dtype=jnp.float32)

    bound = 1.0 / np.sqrt(c * 3 * 3)
    w1 = jax.random.uniform(k1, (c, c, 3, 3), jnp.float32, -bound, bound)
    w2 = jax.random.uniform(k2, (c, c, 3, 3), jnp.float32, -bound, bound)

    g1 = 1.0 + 0.1 * jax.random.normal(kg1, (c,), jnp.float32)
    b1 = 0.1 * jax.random.normal(kb1, (c,), jnp.float32)
    g2 = 1.0 + 0.1 * jax.random.normal(kg2, (c,), jnp.float32)
    b2 = 0.1 * jax.random.normal(kb2, (c,), jnp.float32)

    out = jax.block_until_ready(res_block_pallas(x, w1, w2, g1, b1, g2, b2))
    ref = jax.block_until_ready(res_block_ref(x, w1, w2, g1, b1, g2, b2))

    np.testing.assert_allclose(np.asarray(out), np.asarray(ref),
                               rtol=2e-2, atol=2e-2)
    print("KERNEL_OK")
</pallas_src>

<mosaic_0001>
module attributes {stable_mosaic.version = 11 : i64} {
  func.func @_res_block_kernel(%arg0: memref<32x128xf32, #tpu.memory_space<vmem>>, %arg1: memref<1152x128xf32, #tpu.memory_space<vmem>>, %arg2: memref<1152x128xf32, #tpu.memory_space<vmem>>, %arg3: memref<1x128xf32, #tpu.memory_space<vmem>>, %arg4: memref<1x128xf32, #tpu.memory_space<vmem>>, %arg5: memref<1x128xf32, #tpu.memory_space<vmem>>, %arg6: memref<1x128xf32, #tpu.memory_space<vmem>>, %arg7: memref<128x128xf32, #tpu.memory_space<vmem>>, %arg8: memref<32x128xf32, #tpu.memory_space<vmem>>, %arg9: memref<2x18x128xf32, #tpu.memory_space<vmem>>, %arg10: memref<32x1152xf32, #tpu.memory_space<vmem>>) attributes {dimension_semantics = [], scalar_prefetch = 0 : i64, scratch_operands = 2 : i64, tpu.core_type = #tpu.core_type<tc>} {
    %c0 = arith.constant 0 : index
    %c0_0 = arith.constant 0 : index
    %0 = vector.load %arg0[%c0, %c0_0] : memref<32x128xf32, #tpu.memory_space<vmem>>, vector<32x128xf32>
    %1 = vector.shape_cast %0 : vector<32x128xf32> to vector<2x16x128xf32>
    %c0_1 = arith.constant 0 : index
    %c1 = arith.constant 1 : index
    %c0_2 = arith.constant 0 : index
    %2 = vector.load %arg9[%c0_1, %c1, %c0_2] : memref<2x18x128xf32, #tpu.memory_space<vmem>>, vector<2x16x128xf32>
    tpu.vector_store %arg9[%c0_1, %c1, %c0_2], %1 {strides = array<i32>} : memref<2x18x128xf32, #tpu.memory_space<vmem>>, vector<2x16x128xf32>,
    %3 = vector.extract_strided_slice %1 {offsets = [0, 1, 0], sizes = [2, 1, 128], strides = [1, 1, 1]} : vector<2x16x128xf32> to vector<2x1x128xf32>
    %c0_3 = arith.constant 0 : index
    %c0_4 = arith.constant 0 : index
    %c0_5 = arith.constant 0 : index
    %4 = vector.load %arg9[%c0_3, %c0_4, %c0_5] : memref<2x18x128xf32, #tpu.memory_space<vmem>>, vector<2x1x128xf32>
    tpu.vector_store %arg9[%c0_3, %c0_4, %c0_5], %3 {strides = array<i32>} : memref<2x18x128xf32, #tpu.memory_space<vmem>>, vector<2x1x128xf32>,
    %5 = vector.extract_strided_slice %1 {offsets = [0, 14, 0], sizes = [2, 1, 128], strides = [1, 1, 1]} : vector<2x16x128xf32> to vector<2x1x128xf32>
    %c0_6 = arith.constant 0 : index
    %c17 = arith.constant 17 : index
    %c0_7 = arith.constant 0 : index
    %6 = vector.load %arg9[%c0_6, %c17, %c0_7] : memref<2x18x128xf32, #tpu.memory_space<vmem>>, vector<2x1x128xf32>
    tpu.vector_store %arg9[%c0_6, %c17, %c0_7], %5 {strides = array<i32>} : memref<2x18x128xf32, #tpu.memory_space<vmem>>, vector<2x1x128xf32>,
    %c0_8 = arith.constant 0 : index
    %c0_9 = arith.constant 0 : index
    %c0_10 = arith.constant 0 : index
    %7 = vector.load %arg9[%c0_8, %c0_9, %c0_10] : memref<2x18x128xf32, #tpu.memory_space<vmem>>, vector<2x16x128xf32>
    %8 = vector.extract_strided_slice %7 {offsets = [0, 0, 8], sizes = [2, 16, 8], strides = [1, 1, 1]} : vector<2x16x128xf32> to vector<2x16x8xf32>
    %9 = vector.extract_strided_slice %7 {offsets = [0, 0, 0], sizes = [2, 16, 120], strides = [1, 1, 1]} : vector<2x16x128xf32> to vector<2x16x120xf32>
    %10 = tpu.concatenate %8, %9 in 2 : vector<2x16x8xf32>, vector<2x16x120xf32> -> vector<2x16x128xf32>
    %11 = vector.extract_strided_slice %7 {offsets = [0, 0, 8], sizes = [2, 16, 120], strides = [1, 1, 1]} : vector<2x16x128xf32> to vector<2x16x120xf32>
    %12 = vector.extract_strided_slice %7 {offsets = [0, 0, 112], sizes = [2, 16, 8], strides = [1, 1, 1]} : vector<2x16x128xf32> to vector<2x16x8xf32>
    %13 = tpu.concatenate %11, %12 in 2 : vector<2x16x120xf32>, vector<2x16x8xf32> -> vector<2x16x128xf32>
    %14 = vector.shape_cast %10 : vector<2x16x128xf32> to vector<32x128xf32>
    %c0_11 = arith.constant 0 : index
    %c0_12 = arith.constant 0 : index
    %15 = vector.load %arg10[%c0_11, %c0_12] : memref<32x1152xf32, #tpu.memory_space<vmem>>, vector<32x128xf32>
    tpu.vector_store %arg10[%c0_11, %c0_12], %14 {strides = array<i32>} : memref<32x1152xf32, #tpu.memory_space<vmem>>, vector<32x128xf32>,
    %16 = vector.shape_cast %7 : vector<2x16x128xf32> to vector<32x128xf32>
    %c0_13 = arith.constant 0 : index
    %c128 = arith.constant 128 : index
    %17 = vector.load %arg10[%c0_13, %c128] : memref<32x1152xf32, #tpu.memory_space<vmem>>, vector<32x128xf32>
    tpu.vector_store %arg10[%c0_13, %c128], %16 {strides = array<i32>} : memref<32x1152xf32, #tpu.memory_space<vmem>>, vector<32x128xf32>,
    %18 = vector.shape_cast %13 : vector<2x16x128xf32> to vector<32x128xf32>
    %c0_14 = arith.constant 0 : index
    %c256 = arith.constant 256 : index
    %19 = vector.load %arg10[%c0_14, %c256] : memref<32x1152xf32, #tpu.memory_space<vmem>>, vector<32x128xf32>
    tpu.vector_store %arg10[%c0_14, %c256], %18 {strides = array<i32>} : memref<32x1152xf32, #tpu.memory_space<vmem>>, vector<32x128xf32>,
    %c0_15 = arith.constant 0 : index
    %c1_16 = arith.constant 1 : index
    %c0_17 = arith.constant 0 : index
    %20 = vector.load %arg9[%c0_15, %c1_16, %c0_17] : memref<2x18x128xf32, #tpu.memory_space<vmem>>, vector<2x16x128xf32>
    %21 = vector.extract_strided_slice %20 {offsets = [0, 0, 8], sizes = [2, 16, 8], strides = [1, 1, 1]} : vector<2x16x128xf32> to vector<2x16x8xf32>
    %22 = vector.extract_strided_slice %20 {offsets = [0, 0, 0], sizes = [2, 16, 120], strides = [1, 1, 1]} : vector<2x16x128xf32> to vector<2x16x120xf32>
    %23 = tpu.concatenate %21, %22 in 2 : vector<2x16x8xf32>, vector<2x16x120xf32> -> vector<2x16x128xf32>
    %24 = vector.extract_strided_slice %20 {offsets = [0, 0, 8], sizes = [2, 16, 120], strides = [1, 1, 1]} : vector<2x16x128xf32> to vector<2x16x120xf32>
    %25 = vector.extract_strided_slice %20 {offsets = [0, 0, 112], sizes = [2, 16, 8], strides = [1, 1, 1]} : vector<2x16x128xf32> to vector<2x16x8xf32>
    %26 = tpu.concatenate %24, %25 in 2 : vector<2x16x120xf32>, vector<2x16x8xf32> -> vector<2x16x128xf32>
    %27 = vector.shape_cast %23 : vector<2x16x128xf32> to vector<32x128xf32>
    %c0_18 = arith.constant 0 : index
    %c384 = arith.constant 384 : index
    %28 = vector.load %arg10[%c0_18, %c384] : memref<32x1152xf32, #tpu.memory_space<vmem>>, vector<32x128xf32>
    tpu.vector_store %arg10[%c0_18, %c384], %27 {strides = array<i32>} : memref<32x1152xf32, #tpu.memory_space<vmem>>, vector<32x128xf32>,
    %29 = vector.shape_cast %20 : vector<2x16x128xf32> to vector<32x128xf32>
    %c0_19 = arith.constant 0 : index
    %c512 = arith.constant 512 : index
    %30 = vector.load %arg10[%c0_19, %c512] : memref<32x1152xf32, #tpu.memory_space<vmem>>, vector<32x128xf32>
    tpu.vector_store %arg10[%c0_19, %c512], %29 {strides = array<i32>} : memref<32x1152xf32, #tpu.memory_space<vmem>>, vector<32x128xf32>,
    %31 = vector.shape_cast %26 : vector<2x16x128xf32> to vector<32x128xf32>
    %c0_20 = arith.constant 0 : index
    %c640 = arith.constant 640 : index
    %32 = vector.load %arg10[%c0_20, %c640] : memref<32x1152xf32, #tpu.memory_space<vmem>>, vector<32x128xf32>
    tpu.vector_store %arg10[%c0_20, %c640], %31 {strides = array<i32>} : memref<32x1152xf32, #tpu.memory_space<vmem>>, vector<32x128xf32>,
    %c0_21 = arith.constant 0 : index
    %c2 = arith.constant 2 : index
    %c0_22 = arith.constant 0 : index
    %33 = vector.load %arg9[%c0_21, %c2, %c0_22] : memref<2x18x128xf32, #tpu.memory_space<vmem>>, vector<2x16x128xf32>
    %34 = vector.extract_strided_slice %33 {offsets = [0, 0, 8], sizes = [2, 16, 8], strides = [1, 1, 1]} : vector<2x16x128xf32> to vector<2x16x8xf32>
    %35 = vector.extract_strided_slice %33 {offsets = [0, 0, 0], sizes = [2, 16, 120], strides = [1, 1, 1]} : vector<2x16x128xf32> to vector<2x16x120xf32>
    %36 = tpu.concatenate %34, %35 in 2 : vector<2x16x8xf32>, vector<2x16x120xf32> -> vector<2x16x128xf32>
    %37 = vector.extract_strided_slice %33 {offsets = [0, 0, 8], sizes = [2, 16, 120], strides = [1, 1, 1]} : vector<2x16x128xf32> to vector<2x16x120xf32>
    %38 = vector.extract_strided_slice %33 {offsets = [0, 0, 112], sizes = [2, 16, 8], strides = [1, 1, 1]} : vector<2x16x128xf32> to vector<2x16x8xf32>
    %39 = tpu.concatenate %37, %38 in 2 : vector<2x16x120xf32>, vector<2x16x8xf32> -> vector<2x16x128xf32>
    %40 = vector.shape_cast %36 : vector<2x16x128xf32> to vector<32x128xf32>
    %c0_23 = arith.constant 0 : index
    %c768 = arith.constant 768 : index
    %41 = vector.load %arg10[%c0_23, %c768] : memref<32x1152xf32, #tpu.memory_space<vmem>>, vector<32x128xf32>
    tpu.vector_store %arg10[%c0_23, %c768], %40 {strides = array<i32>} : memref<32x1152xf32, #tpu.memory_space<vmem>>, vector<32x128xf32>,
    %42 = vector.shape_cast %33 : vector<2x16x128xf32> to vector<32x128xf32>
    %c0_24 = arith.constant 0 : index
    %c896 = arith.constant 896 : index
    %43 = vector.load %arg10[%c0_24, %c896] : memref<32x1152xf32, #tpu.memory_space<vmem>>, vector<32x128xf32>
    tpu.vector_store %arg10[%c0_24, %c896], %42 {strides = array<i32>} : memref<32x1152xf32, #tpu.memory_space<vmem>>, vector<32x128xf32>,
    %44 = vector.shape_cast %39 : vector<2x16x128xf32> to vector<32x128xf32>
    %c0_25 = arith.constant 0 : index
    %c1024 = arith.constant 1024 : index
    %45 = vector.load %arg10[%c0_25, %c1024] : memref<32x1152xf32, #tpu.memory_space<vmem>>, vector<32x128xf32>
    tpu.vector_store %arg10[%c0_25, %c1024], %44 {strides = array<i32>} : memref<32x1152xf32, #tpu.memory_space<vmem>>, vector<32x128xf32>,
    %c0_26 = arith.constant 0 : index
    %c0_27 = arith.constant 0 : index
    %46 = vector.load %arg10[%c0_26, %c0_27] : memref<32x1152xf32, #tpu.memory_space<vmem>>, vector<32x1152xf32>
    %c0_28 = arith.constant 0 : index
    %c0_29 = arith.constant 0 : index
    %47 = vector.load %arg1[%c0_28, %c0_29] : memref<1152x128xf32, #tpu.memory_space<vmem>>, vector<1152x128xf32>
    %cst = arith.constant dense<0.000000e+00> : vector<32x128xf32>
    %48 = tpu.matmul %46, %47, %cst {dimension_numbers = #tpu.dot_dimension_numbers<[1], [0], [0], [1], [0, 0, 1, 1], [], []>} : vector<32x1152xf32>, vector<1152x128xf32>, vector<32x128xf32> -> vector<32x128xf32>
    %c0_30 = arith.constant 0 : index
    %c0_31 = arith.constant 0 : index
    %49 = vector.load %arg3[%c0_30, %c0_31] : memref<1x128xf32, #tpu.memory_space<vmem>>, vector<1x128xf32>
    %c0_32 = arith.constant 0 : index
    %c0_33 = arith.constant 0 : index
    %50 = vector.load %arg4[%c0_32, %c0_33] : memref<1x128xf32, #tpu.memory_space<vmem>>, vector<1x128xf32>
    %cst_34 = arith.constant dense<0.000000e+00> : vector<128xf32>
    %51 = vector.multi_reduction <add>, %48, %cst_34 [0] : vector<32x128xf32> to vector<128xf32>
    %52 = vector.shape_cast %51 : vector<128xf32> to vector<1x128xf32>
    %c0_35 = arith.constant 0 : index
    %c0_36 = arith.constant 0 : index
    %53 = vector.load %arg7[%c0_35, %c0_36] : memref<128x128xf32, #tpu.memory_space<vmem>>, vector<128x128xf32>
    %cst_37 = arith.constant dense<0.000000e+00> : vector<1x128xf32>
    %54 = tpu.matmul %52, %53, %cst_37 {dimension_numbers = #tpu.dot_dimension_numbers<[1], [0], [0], [1], [0, 0, 1, 1], [], []>} : vector<1x128xf32>, vector<128x128xf32>, vector<1x128xf32> -> vector<1x128xf32>
    %55 = vector.broadcast %54 : vector<1x128xf32> to vector<32x128xf32>
    %56 = arith.subf %48, %55 : vector<32x128xf32>
    %57 = arith.mulf %56, %56 : vector<32x128xf32>
    %cst_38 = arith.constant dense<0.000000e+00> : vector<128xf32>
    %58 = vector.multi_reduction <add>, %57, %cst_38 [0] : vector<32x128xf32> to vector<128xf32>
    %59 = vector.shape_cast %58 : vector<128xf32> to vector<1x128xf32>
    %c0_39 = arith.constant 0 : index
    %c0_40 = arith.constant 0 : index
    %60 = vector.load %arg7[%c0_39, %c0_40] : memref<128x128xf32, #tpu.memory_space<vmem>>, vector<128x128xf32>
    %cst_41 = arith.constant dense<0.000000e+00> : vector<1x128xf32>
    %61 = tpu.matmul %59, %60, %cst_41 {dimension_numbers = #tpu.dot_dimension_numbers<[1], [0], [0], [1], [0, 0, 1, 1], [], []>} : vector<1x128xf32>, vector<128x128xf32>, vector<1x128xf32> -> vector<1x128xf32>
    %cst_42 = arith.constant 9.99999974E-6 : f32
    %62 = vector.broadcast %cst_42 : f32 to vector<1x128xf32>
    %63 = arith.addf %61, %62 : vector<1x128xf32>
    %64 = math.rsqrt %63 : vector<1x128xf32>
    %65 = arith.mulf %64, %49 : vector<1x128xf32>
    %66 = vector.broadcast %65 : vector<1x128xf32> to vector<32x128xf32>
    %67 = arith.mulf %56, %66 : vector<32x128xf32>
    %68 = vector.broadcast %50 : vector<1x128xf32> to vector<32x128xf32>
    %69 = arith.addf %67, %68 : vector<32x128xf32>
    %cst_43 = arith.constant 0.000000e+00 : f32
    %70 = vector.broadcast %cst_43 : f32 to vector<32x128xf32>
    %71 = arith.maximumf %69, %70 : vector<32x128xf32>
    %72 = vector.shape_cast %71 : vector<32x128xf32> to vector<2x16x128xf32>
    %c0_44 = arith.constant 0 : index
    %c1_45 = arith.constant 1 : index
    %c0_46 = arith.constant 0 : index
    %73 = vector.load %arg9[%c0_44, %c1_45, %c0_46] : memref<2x18x128xf32, #tpu.memory_space<vmem>>, vector<2x16x128xf32>
    tpu.vector_store %arg9[%c0_44, %c1_45, %c0_46], %72 {strides = array<i32>} : memref<2x18x128xf32, #tpu.memory_space<vmem>>, vector<2x16x128xf32>,
    %74 = vector.extract_strided_slice %72 {offsets = [0, 1, 0], sizes = [2, 1, 128], strides = [1, 1, 1]} : vector<2x16x128xf32> to vector<2x1x128xf32>
    %c0_47 = arith.constant 0 : index
    %c0_48 = arith.constant 0 : index
    %c0_49 = arith.constant 0 : index
    %75 = vector.load %arg9[%c0_47, %c0_48, %c0_49] : memref<2x18x128xf32, #tpu.memory_space<vmem>>, vector<2x1x128xf32>
    tpu.vector_store %arg9[%c0_47, %c0_48, %c0_49], %74 {strides = array<i32>} : memref<2x18x128xf32, #tpu.memory_space<vmem>>, vector<2x1x128xf32>,
    %76 = vector.extract_strided_slice %72 {offsets = [0, 14, 0], sizes = [2, 1, 128], strides = [1, 1, 1]} : vector<2x16x128xf32> to vector<2x1x128xf32>
    %c0_50 = arith.constant 0 : index
    %c17_51 = arith.constant 17 : index
    %c0_52 = arith.constant 0 : index
    %77 = vector.load %arg9[%c0_50, %c17_51, %c0_52] : memref<2x18x128xf32, #tpu.memory_space<vmem>>, vector<2x1x128xf32>
    tpu.vector_store %arg9[%c0_50, %c17_51, %c0_52], %76 {strides = array<i32>} : memref<2x18x128xf32, #tpu.memory_space<vmem>>, vector<2x1x128xf32>,
    %c0_53 = arith.constant 0 : index
    %c0_54 = arith.constant 0 : index
    %c0_55 = arith.constant 0 : index
    %78 = vector.load %arg9[%c0_53, %c0_54, %c0_55] : memref<2x18x128xf32, #tpu.memory_space<vmem>>, vector<2x16x128xf32>
    %79 = vector.extract_strided_slice %78 {offsets = [0, 0, 8], sizes = [2, 16, 8], strides = [1, 1, 1]} : vector<2x16x128xf32> to vector<2x16x8xf32>
    %80 = vector.extract_strided_slice %78 {offsets = [0, 0, 0], sizes = [2, 16, 120], strides = [1, 1, 1]} : vector<2x16x128xf32> to vector<2x16x120xf32>
    %81 = tpu.concatenate %79, %80 in 2 : vector<2x16x8xf32>, vector<2x16x120xf32> -> vector<2x16x128xf32>
    %82 = vector.extract_strided_slice %78 {offsets = [0, 0, 8], sizes = [2, 16, 120], strides = [1, 1, 1]} : vector<2x16x128xf32> to vector<2x16x120xf32>
    %83 = vector.extract_strided_slice %78 {offsets = [0, 0, 112], sizes = [2, 16, 8], strides = [1, 1, 1]} : vector<2x16x128xf32> to vector<2x16x8xf32>
    %84 = tpu.concatenate %82, %83 in 2 : vector<2x16x120xf32>, vector<2x16x8xf32> -> vector<2x16x128xf32>
    %85 = vector.shape_cast %81 : vector<2x16x128xf32> to vector<32x128xf32>
    %c0_56 = arith.constant 0 : index
    %c0_57 = arith.constant 0 : index
    %86 = vector.load %arg10[%c0_56, %c0_57] : memref<32x1152xf32, #tpu.memory_space<vmem>>, vector<32x128xf32>
    tpu.vector_store %arg10[%c0_56, %c0_57], %85 {strides = array<i32>} : memref<32x1152xf32, #tpu.memory_space<vmem>>, vector<32x128xf32>,
    %87 = vector.shape_cast %78 : vector<2x16x128xf32> to vector<32x128xf32>
    %c0_58 = arith.constant 0 : index
    %c128_59 = arith.constant 128 : index
    %88 = vector.load %arg10[%c0_58, %c128_59] : memref<32x1152xf32, #tpu.memory_space<vmem>>, vector<32x128xf32>
    tpu.vector_store %arg10[%c0_58, %c128_59], %87 {strides = array<i32>} : memref<32x1152xf32, #tpu.memory_space<vmem>>, vector<32x128xf32>,
    %89 = vector.shape_cast %84 : vector<2x16x128xf32> to vector<32x128xf32>
    %c0_60 = arith.constant 0 : index
    %c256_61 = arith.constant 256 : index
    %90 = vector.load %arg10[%c0_60, %c256_61] : memref<32x1152xf32, #tpu.memory_space<vmem>>, vector<32x128xf32>
    tpu.vector_store %arg10[%c0_60, %c256_61], %89 {strides = array<i32>} : memref<32x1152xf32, #tpu.memory_space<vmem>>, vector<32x128xf32>,
    %c0_62 = arith.constant 0 : index
    %c1_63 = arith.constant 1 : index
    %c0_64 = arith.constant 0 : index
    %91 = vector.load %arg9[%c0_62, %c1_63, %c0_64] : memref<2x18x128xf32, #tpu.memory_space<vmem>>, vector<2x16x128xf32>
    %92 = vector.extract_strided_slice %91 {offsets = [0, 0, 8], sizes = [2, 16, 8], strides = [1, 1, 1]} : vector<2x16x128xf32> to vector<2x16x8xf32>
    %93 = vector.extract_strided_slice %91 {offsets = [0, 0, 0], sizes = [2, 16, 120], strides = [1, 1, 1]} : vector<2x16x128xf32> to vector<2x16x120xf32>
    %94 = tpu.concatenate %92, %93 in 2 : vector<2x16x8xf32>, vector<2x16x120xf32> -> vector<2x16x128xf32>
    %95 = vector.extract_strided_slice %91 {offsets = [0, 0, 8], sizes = [2, 16, 120], strides = [1, 1, 1]} : vector<2x16x128xf32> to vector<2x16x120xf32>
    %96 = vector.extract_strided_slice %91 {offsets = [0, 0, 112], sizes = [2, 16, 8], strides = [1, 1, 1]} : vector<2x16x128xf32> to vector<2x16x8xf32>
    %97 = tpu.concatenate %95, %96 in 2 : vector<2x16x120xf32>, vector<2x16x8xf32> -> vector<2x16x128xf32>
    %98 = vector.shape_cast %94 : vector<2x16x128xf32> to vector<32x128xf32>
    %c0_65 = arith.constant 0 : index
    %c384_66 = arith.constant 384 : index
    %99 = vector.load %arg10[%c0_65, %c384_66] : memref<32x1152xf32, #tpu.memory_space<vmem>>, vector<32x128xf32>
    tpu.vector_store %arg10[%c0_65, %c384_66], %98 {strides = array<i32>} : memref<32x1152xf32, #tpu.memory_space<vmem>>, vector<32x128xf32>,
    %100 = vector.shape_cast %91 : vector<2x16x128xf32> to vector<32x128xf32>
    %c0_67 = arith.constant 0 : index
    %c512_68 = arith.constant 512 : index
    %101 = vector.load %arg10[%c0_67, %c512_68] : memref<32x1152xf32, #tpu.memory_space<vmem>>, vector<32x128xf32>
    tpu.vector_store %arg10[%c0_67, %c512_68], %100 {strides = array<i32>} : memref<32x1152xf32, #tpu.memory_space<vmem>>, vector<32x128xf32>,
    %102 = vector.shape_cast %97 : vector<2x16x128xf32> to vector<32x128xf32>
    %c0_69 = arith.constant 0 : index
    %c640_70 = arith.constant 640 : index
    %103 = vector.load %arg10[%c0_69, %c640_70] : memref<32x1152xf32, #tpu.memory_space<vmem>>, vector<32x128xf32>
    tpu.vector_store %arg10[%c0_69, %c640_70], %102 {strides = array<i32>} : memref<32x1152xf32, #tpu.memory_space<vmem>>, vector<32x128xf32>,
    %c0_71 = arith.constant 0 : index
    %c2_72 = arith.constant 2 : index
    %c0_73 = arith.constant 0 : index
    %104 = vector.load %arg9[%c0_71, %c2_72, %c0_73] : memref<2x18x128xf32, #tpu.memory_space<vmem>>, vector<2x16x128xf32>
    %105 = vector.extract_strided_slice %104 {offsets = [0, 0, 8], sizes = [2, 16, 8], strides = [1, 1, 1]} : vector<2x16x128xf32> to vector<2x16x8xf32>
    %106 = vector.extract_strided_slice %104 {offsets = [0, 0, 0], sizes = [2, 16, 120], strides = [1, 1, 1]} : vector<2x16x128xf32> to vector<2x16x120xf32>
    %107 = tpu.concatenate %105, %106 in 2 : vector<2x16x8xf32>, vector<2x16x120xf32> -> vector<2x16x128xf32>
    %108 = vector.extract_strided_slice %104 {offsets = [0, 0, 8], sizes = [2, 16, 120], strides = [1, 1, 1]} : vector<2x16x128xf32> to vector<2x16x120xf32>
    %109 = vector.extract_strided_slice %104 {offsets = [0, 0, 112], sizes = [2, 16, 8], strides = [1, 1, 1]} : vector<2x16x128xf32> to vector<2x16x8xf32>
    %110 = tpu.concatenate %108, %109 in 2 : vector<2x16x120xf32>, vector<2x16x8xf32> -> vector<2x16x128xf32>
    %111 = vector.shape_cast %107 : vector<2x16x128xf32> to vector<32x128xf32>
    %c0_74 = arith.constant 0 : index
    %c768_75 = arith.constant 768 : index
    %112 = vector.load %arg10[%c0_74, %c768_75] : memref<32x1152xf32, #tpu.memory_space<vmem>>, vector<32x128xf32>
    tpu.vector_store %arg10[%c0_74, %c768_75], %111 {strides = array<i32>} : memref<32x1152xf32, #tpu.memory_space<vmem>>, vector<32x128xf32>,
    %113 = vector.shape_cast %104 : vector<2x16x128xf32> to vector<32x128xf32>
    %c0_76 = arith.constant 0 : index
    %c896_77 = arith.constant 896 : index
    %114 = vector.load %arg10[%c0_76, %c896_77] : memref<32x1152xf32, #tpu.memory_space<vmem>>, vector<32x128xf32>
    tpu.vector_store %arg10[%c0_76, %c896_77], %113 {strides = array<i32>} : memref<32x1152xf32, #tpu.memory_space<vmem>>, vector<32x128xf32>,
    %115 = vector.shape_cast %110 : vector<2x16x128xf32> to vector<32x128xf32>
    %c0_78 = arith.constant 0 : index
    %c1024_79 = arith.constant 1024 : index
    %116 = vector.load %arg10[%c0_78, %c1024_79] : memref<32x1152xf32, #tpu.memory_space<vmem>>, vector<32x128xf32>
    tpu.vector_store %arg10[%c0_78, %c1024_79], %115 {strides = array<i32>} : memref<32x1152xf32, #tpu.memory_space<vmem>>, vector<32x128xf32>,
    %c0_80 = arith.constant 0 : index
    %c0_81 = arith.constant 0 : index
    %117 = vector.load %arg10[%c0_80, %c0_81] : memref<32x1152xf32, #tpu.memory_space<vmem>>, vector<32x1152xf32>
    %c0_82 = arith.constant 0 : index
    %c0_83 = arith.constant 0 : index
    %118 = vector.load %arg2[%c0_82, %c0_83] : memref<1152x128xf32, #tpu.memory_space<vmem>>, vector<1152x128xf32>
    %cst_84 = arith.constant dense<0.000000e+00> : vector<32x128xf32>
    %119 = tpu.matmul %117, %118, %cst_84 {dimension_numbers = #tpu.dot_dimension_numbers<[1], [0], [0], [1], [0, 0, 1, 1], [], []>} : vector<32x1152xf32>, vector<1152x128xf32>, vector<32x128xf32> -> vector<32x128xf32>
    %c0_85 = arith.constant 0 : index
    %c0_86 = arith.constant 0 : index
    %120 = vector.load %arg5[%c0_85, %c0_86] : memref<1x128xf32, #tpu.memory_space<vmem>>, vector<1x128xf32>
    %c0_87 = arith.constant 0 : index
    %c0_88 = arith.constant 0 : index
    %121 = vector.load %arg6[%c0_87, %c0_88] : memref<1x128xf32, #tpu.memory_space<vmem>>, vector<1x128xf32>
    %cst_89 = arith.constant dense<0.000000e+00> : vector<128xf32>
    %122 = vector.multi_reduction <add>, %119, %cst_89 [0] : vector<32x128xf32> to vector<128xf32>
    %123 = vector.shape_cast %122 : vector<128xf32> to vector<1x128xf32>
    %c0_90 = arith.constant 0 : index
    %c0_91 = arith.constant 0 : index
    %124 = vector.load %arg7[%c0_90, %c0_91] : memref<128x128xf32, #tpu.memory_space<vmem>>, vector<128x128xf32>
    %cst_92 = arith.constant dense<0.000000e+00> : vector<1x128xf32>
    %125 = tpu.matmul %123, %124, %cst_92 {dimension_numbers = #tpu.dot_dimension_numbers<[1], [0], [0], [1], [0, 0, 1, 1], [], []>} : vector<1x128xf32>, vector<128x128xf32>, vector<1x128xf32> -> vector<1x128xf32>
    %126 = vector.broadcast %125 : vector<1x128xf32> to vector<32x128xf32>
    %127 = arith.subf %119, %126 : vector<32x128xf32>
    %128 = arith.mulf %127, %127 : vector<32x128xf32>
    %cst_93 = arith.constant dense<0.000000e+00> : vector<128xf32>
    %129 = vector.multi_reduction <add>, %128, %cst_93 [0] : vector<32x128xf32> to vector<128xf32>
    %130 = vector.shape_cast %129 : vector<128xf32> to vector<1x128xf32>
    %c0_94 = arith.constant 0 : index
    %c0_95 = arith.constant 0 : index
    %131 = vector.load %arg7[%c0_94, %c0_95] : memref<128x128xf32, #tpu.memory_space<vmem>>, vector<128x128xf32>
    %cst_96 = arith.constant dense<0.000000e+00> : vector<1x128xf32>
    %132 = tpu.matmul %130, %131, %cst_96 {dimension_numbers = #tpu.dot_dimension_numbers<[1], [0], [0], [1], [0, 0, 1, 1], [], []>} : vector<1x128xf32>, vector<128x128xf32>, vector<1x128xf32> -> vector<1x128xf32>
    %cst_97 = arith.constant 9.99999974E-6 : f32
    %133 = vector.broadcast %cst_97 : f32 to vector<1x128xf32>
    %134 = arith.addf %132, %133 : vector<1x128xf32>
    %135 = math.rsqrt %134 : vector<1x128xf32>
    %136 = arith.mulf %135, %120 : vector<1x128xf32>
    %137 = vector.broadcast %136 : vector<1x128xf32> to vector<32x128xf32>
    %138 = arith.mulf %127, %137 : vector<32x128xf32>
    %139 = vector.broadcast %121 : vector<1x128xf32> to vector<32x128xf32>
    %140 = arith.addf %138, %139 : vector<32x128xf32>
    %c0_98 = arith.constant 0 : index
    %c0_99 = arith.constant 0 : index
    %141 = vector.load %arg0[%c0_98, %c0_99] : memref<32x128xf32, #tpu.memory_space<vmem>>, vector<32x128xf32>
    %142 = arith.addf %140, %141 : vector<32x128xf32>
    %c0_100 = arith.constant 0 : index
    %c0_101 = arith.constant 0 : index
    %143 = vector.load %arg8[%c0_100, %c0_101] : memref<32x128xf32, #tpu.memory_space<vmem>>, vector<32x128xf32>
    tpu.vector_store %arg8[%c0_100, %c0_101], %142 {strides = array<i32>} : memref<32x128xf32, #tpu.memory_space<vmem>>, vector<32x128xf32>,
    return
  }
}

</mosaic_0001>

<bundles_post_ra>
// kernel: res_block_pallas.1
= control target key start
LH: loop header
LB: loop body
LE: loop exit
PB: predicated region body
PF: predicated region fallthrough
CT: control target
= control target key end

     0   :  { %s3132_s9 = smov 120   ;;  %s3133_s24 = smov 8   ;;  %vm73_vm0 = vcmask 64512   ;;  %vm78_vm1 = vcmask 982016   ;;  %vm3135_vm2 = vmmov 0   ;;  %s4590_s0 = inlined_call_operand.vmem [shape: f32[32,128], index: 0, kind: input, shape index: {}]   ;;  %s4591_s1 = inlined_call_operand.vmem [shape: f32[1152,128], index: 1, kind: input, shape index: {}]   ;;  %s4592_s7 = inlined_call_operand.vmem [shape: f32[128,128], index: 7, kind: input, shape index: {}]   ;;  %s4593_s2 = inlined_call_operand.vmem [shape: f32[1152,128], index: 2, kind: input, shape index: {}]   ;;  %s4594_s3 = inlined_call_operand.vmem [shape: f32[1,128], index: 3, kind: input, shape index: {}]   ;;  %s4595_s4 = inlined_call_operand.vmem [shape: f32[1,128], index: 4, kind: input, shape index: {}]   ;;  %s4596_s5 = inlined_call_operand.vmem [shape: f32[1,128], index: 5, kind: input, shape index: {}]   ;;  %s4597_s6 = inlined_call_operand.vmem [shape: f32[1,128], index: 6, kind: input, shape index: {}]   ;;  %s4598_s8 = inlined_call_operand.vmem [shape: f32[32,128], index: 8, kind: output, shape index: {}]  }
   0x1   :  { %v3185_v0 = vld [vmem:[%s4590_s0] sm:$0xff]  ;;  %v3190_v1 = vld [vmem:[%s4590_s0 + $0x8] sm:$0xff]  ;;  %v3195_v2 = vld [vmem:[%s4590_s0 + $0x10] sm:$0xff] }
   0x2   :  { %33 = vst [vmem:[#allocation2 + $0x1] sm:$0xff] %v3185_v0  ;;  %37 = vst [vmem:[#allocation2 - $0x1] sm:$0x2] %v3185_v0  ;;  %v3206_v3 = vld [vmem:[%s4590_s0 + $0x18] sm:$0xff]  ;;  %v251_v4 = vld [vmem:[%s4591_s1 + $0x80] sm:$0xff] }
   0x3   :  { %34 = vst [vmem:[#allocation2 + $0x9] sm:$0xff] %v3190_v1  ;;  %39 = vst [vmem:[#allocation2 + $0xb] sm:$0x40] %v3190_v1  ;;  %v252_v5 = vld [vmem:[%s4591_s1 + $0x88] sm:$0xff]  ;;  %v235_v7 = vld [vmem:[%s4591_s1] sm:$0xff] }
   0x4   :  { %35 = vst [vmem:[#allocation2 + $0x19] sm:$0xff] %v3195_v2  ;;  %38 = vst [vmem:[#allocation2 + $0x17] sm:$0x2] %v3195_v2  ;;  %v2687_v6 = vpack.c.bf16 %v252_v5, %v251_v4  ;;  %v236_v8 = vld [vmem:[%s4591_s1 + $0x8] sm:$0xff]  ;;  %v253_v9 = vld [vmem:[%s4591_s1 + $0x90] sm:$0xff] }
   0x5   :  { %36 = vst [vmem:[#allocation2 + $0x21] sm:$0xff] %v3206_v3  ;;  %40 = vst [vmem:[#allocation2 + $0x23] sm:$0x40] %v3206_v3  ;;  %v2689_v10 = vpack.c.bf16 %v236_v8, %v235_v7  ;;  %v254_v11 = vld [vmem:[%s4591_s1 + $0x98] sm:$0xff]  ;;  %v237_v12 = vld [vmem:[%s4591_s1 + $0x10] sm:$0xff] }
   0x6   :  { %v238_v13 = vld [vmem:[%s4591_s1 + $0x18] sm:$0xff]  ;;  %2688 = vmatprep.subr.bf16.mxu0 %v2687_v6  ;;  %v2691_v14 = vpack.c.bf16 %v254_v11, %v253_v9  ;;  %v283_v15 = vld [vmem:[%s4591_s1 + $0x180] sm:$0xff]  ;;  %v284_v16 = vld [vmem:[%s4591_s1 + $0x188] sm:$0xff] }
   0x7   :  { %v267_v17 = vld [vmem:[%s4591_s1 + $0x100] sm:$0xff]  ;;  %2690 = vmatpush3.bf16.msra.mxu0 %v2689_v10  ;;  %v2693_v18 = vpack.c.bf16 %v238_v13, %v237_v12  ;;  %v2719_v19 = vpack.c.bf16 %v284_v16, %v283_v15  ;;  %v268_v20 = vld [vmem:[%s4591_s1 + $0x108] sm:$0xff]  ;;  %v285_v27 = vld [vmem:[%s4591_s1 + $0x190] sm:$0xff] }
   0x8   :  { %v255_v21 = vld [vmem:[%s4591_s1 + $0xa0] sm:$0xff]  ;;  %v256_v22 = vld [vmem:[%s4591_s1 + $0xa8] sm:$0xff]  ;;  %2692 = vmatprep.subr.bf16.mxu0 %v2691_v14  ;;  %v2721_v23 = vpack.c.bf16 %v268_v20, %v267_v17  ;;  %v286_v28 = vld [vmem:[%s4591_s1 + $0x198] sm:$0xff] }
   0x9   :  { %v2695_v24 = vpack.c.bf16 %v256_v22, %v255_v21  ;;  %v239_v25 = vld [vmem:[%s4591_s1 + $0x20] sm:$0xff]  ;;  %v240_v26 = vld [vmem:[%s4591_s1 + $0x28] sm:$0xff]  ;;  %2720 = vmatprep.subr.bf16.mxu1 %v2719_v19  ;;  %v269_v29 = vld [vmem:[%s4591_s1 + $0x110] sm:$0xff]  ;;  %v2723_v33 = vpack.c.bf16 %v286_v28, %v285_v27 }
   0xa   :  { %v270_v30 = vld [vmem:[%s4591_s1 + $0x118] sm:$0xff]  ;;  %v41_v31 = vld [vmem:[#allocation2] sm:$0xff]  ;;  %v3270_v32 = vld [vmem:[#allocation2 + $0x8] sm:$0xff]  ;;  %2722 = vmatpush3.bf16.msra.mxu1 %v2721_v23  ;;  %v2697_v36 = vpack.c.bf16 %v240_v26, %v239_v25 }
   0xb   :  { %v2725_v34 = vpack.c.bf16 %v270_v30, %v269_v29  ;;  %49 = vrot.lane.b32.xlu0 %v41_v31, %s3132_s9  ;;  %v3108_v35 = vpack.i.bf16 %v3185_v0, %v3270_v32  ;;  %2694 = vmatpush3.bf16.msra.mxu0 %v2693_v18  ;;  %v257_v37 = vld [vmem:[%s4591_s1 + $0xb0] sm:$0xff]  ;;  %v258_v38 = vld [vmem:[%s4591_s1 + $0xb8] sm:$0xff]  ;;  %v287_v43 = vld [vmem:[%s4591_s1 + $0x1a0] sm:$0xff] }
   0xc   :  { %2696 = vmatprep.subr.bf16.mxu0 %v2695_v24  ;;  %2724 = vmatprep.subr.bf16.mxu1 %v2723_v33  ;;  %v241_v39 = vld [vmem:[%s4591_s1 + $0x30] sm:$0xff]  ;;  %v242_v40 = vld [vmem:[%s4591_s1 + $0x38] sm:$0xff]  ;;  %v2699_v42 = vpack.c.bf16 %v258_v38, %v257_v37  ;;  %v288_v44 = vld [vmem:[%s4591_s1 + $0x1a8] sm:$0xff] }
   0xd   :  { %3109 = vrot.lane.b32.xlu1 %v3108_v35, %s3132_s9  ;;  %443 = vmatprep.mubr.f32.mxu0 %v41_v31  ;;  %v3288_v41 = vld [vmem:[#allocation2 + $0x18] sm:$0xff]  ;;  %v271_v45 = vld [vmem:[%s4591_s1 + $0x120] sm:$0xff]  ;;  %v2701_v46 = vpack.c.bf16 %v242_v40, %v241_v39  ;;  %v2727_v47 = vpack.c.bf16 %v288_v44, %v287_v43  ;;  %v272_v48 = vld [vmem:[%s4591_s1 + $0x128] sm:$0xff] }
   0xe   :  { %2726 = vmatpush3.bf16.msra.mxu1 %v2725_v34  ;;  %v259_v49 = vld [vmem:[%s4591_s1 + $0xc0] sm:$0xff]  ;;  %v260_v50 = vld [vmem:[%s4591_s1 + $0xc8] sm:$0xff]  ;;  %v2729_v51 = vpack.c.bf16 %v272_v48, %v271_v45  ;;  %v289_v55 = vld [vmem:[%s4591_s1 + $0x1b0] sm:$0xff] }
   0xf   :  { %61 = vrot.lane.b32.xlu0 %v41_v31, %s3133_s24  ;;  %2698 = vmatpush3.bf16.msra.mxu0 %v2697_v36  ;;  %v2703_v52 = vpack.c.bf16 %v260_v50, %v259_v49  ;;  %v243_v53 = vld [vmem:[%s4591_s1 + $0x40] sm:$0xff]  ;;  %v244_v54 = vld [vmem:[%s4591_s1 + $0x48] sm:$0xff]  ;;  %v290_v56 = vld [vmem:[%s4591_s1 + $0x1b8] sm:$0xff] }
  0x10   :  { %2700 = vmatprep.subr.bf16.mxu0 %v2699_v42  ;;  %2728 = vmatprep.subr.bf16.mxu1 %v2727_v47  ;;  %v273_v57 = vld [vmem:[%s4591_s1 + $0x130] sm:$0xff]  ;;  %v274_v58 = vld [vmem:[%s4591_s1 + $0x138] sm:$0xff]  ;;  %v3328_v59 = vld [vmem:[#allocation2 + $0x20] sm:$0xff]  ;;  %v2731_v60 = vpack.c.bf16 %v290_v56, %v289_v55  ;;  %v2705_v4 = vpack.c.bf16 %v244_v54, %v243_v53 }
  0x11   :  { %3114 = vrot.lane.b32.xlu1 %v3108_v35, %s3133_s24  ;;  %v2733_v61 = vpack.c.bf16 %v274_v58, %v273_v57  ;;  %v261_v62 = vld [vmem:[%s4591_s1 + $0xd0] sm:$0xff]  ;;  %v262_v63 = vld [vmem:[%s4591_s1 + $0xd8] sm:$0xff]  ;;  %v291_v6 = vld [vmem:[%s4591_s1 + $0x1c0] sm:$0xff] }
  0x12   :  { %2730 = vmatpush3.bf16.msra.mxu1 %v2729_v51  ;;  %v245_v5 = vld [vmem:[%s4591_s1 + $0x50] sm:$0xff]  ;;  %v292_v7 = vld [vmem:[%s4591_s1 + $0x1c8] sm:$0xff]  ;;  %v2707_v8 = vpack.c.bf16 %v262_v63, %v261_v62  ;;  %v246_v9 = vld [vmem:[%s4591_s1 + $0x58] sm:$0xff] }
  0x13   :  { %53 = vrot.lane.b32.xlu0 %v3288_v41, %s3132_s9  ;;  %2702 = vmatpush3.bf16.msra.mxu0 %v2701_v46  ;;  %v2735_v10 = vpack.c.bf16 %v292_v7, %v291_v6  ;;  %v275_v11 = vld [vmem:[%s4591_s1 + $0x140] sm:$0xff]  ;;  %v276_v12 = vld [vmem:[%s4591_s1 + $0x148] sm:$0xff]  ;;  %v293_v16 = vld [vmem:[%s4591_s1 + $0x1d0] sm:$0xff]  ;;  %v2709_v18 = vpack.c.bf16 %v246_v9, %v245_v5 }
  0x14   :  { %2704 = vmatprep.subr.bf16.mxu0 %v2703_v52  ;;  %2732 = vmatprep.subr.bf16.mxu1 %v2731_v60  ;;  %v263_v13 = vld [vmem:[%s4591_s1 + $0xe0] sm:$0xff]  ;;  %v264_v14 = vld [vmem:[%s4591_s1 + $0xe8] sm:$0xff]  ;;  %v2737_v15 = vpack.c.bf16 %v276_v12, %v275_v11  ;;  %v294_v17 = vld [vmem:[%s4591_s1 + $0x1d8] sm:$0xff] }
  0x15   :  { %65 = vrot.lane.b32.xlu1 %v3288_v41, %s3133_s24  ;;  %v277_v19 = vld [vmem:[%s4591_s1 + $0x150] sm:$0xff]  ;;  %v278_v20 = vld [vmem:[%s4591_s1 + $0x158] sm:$0xff]  ;;  %v2711_v21 = vpack.c.bf16 %v264_v14, %v263_v13  ;;  %v247_v22 = vld [vmem:[%s4591_s1 + $0x60] sm:$0xff]  ;;  %v2739_v24 = vpack.c.bf16 %v294_v17, %v293_v16 }
  0x16   :  { %2734 = vmatpush3.bf16.msra.mxu1 %v2733_v61  ;;  %v248_v23 = vld [vmem:[%s4591_s1 + $0x68] sm:$0xff]  ;;  %v265_v25 = vld [vmem:[%s4591_s1 + $0xf0] sm:$0xff]  ;;  %v266_v26 = vld [vmem:[%s4591_s1 + $0xf8] sm:$0xff]  ;;  %v2741_v29 = vpack.c.bf16 %v278_v20, %v277_v19 }
  0x17   :  { %55 = vrot.lane.b32.xlu0 %v3328_v59, %s3132_s9  ;;  %2706 = vmatpush3.bf16.msra.mxu0 %v2705_v4  ;;  %v295_v27 = vld [vmem:[%s4591_s1 + $0x1e0] sm:$0xff]  ;;  %v296_v28 = vld [vmem:[%s4591_s1 + $0x1e8] sm:$0xff]  ;;  %v2713_v30 = vpack.c.bf16 %v248_v23, %v247_v22  ;;  %v2715_v34 = vpack.c.bf16 %v266_v26, %v265_v25  ;;  %v249_v35 = vld [vmem:[%s4591_s1 + $0x70] sm:$0xff] }
  0x18   :  { %2708 = vmatprep.subr.bf16.mxu0 %v2707_v8  ;;  %2736 = vmatprep.subr.bf16.mxu1 %v2735_v10  ;;  %v279_v31 = vld [vmem:[%s4591_s1 + $0x160] sm:$0xff]  ;;  %v280_v33 = vld [vmem:[%s4591_s1 + $0x168] sm:$0xff]  ;;  %v250_v36 = vld [vmem:[%s4591_s1 + $0x78] sm:$0xff]  ;;  %v2743_v37 = vpack.c.bf16 %v296_v28, %v295_v27 }
  0x19   :  { %67 = vrot.lane.b32.xlu1 %v3328_v59, %s3133_s24  ;;  %v315_v38 = vld [vmem:[%s4591_s1 + $0x280] sm:$0xff]  ;;  %v316_v39 = vld [vmem:[%s4591_s1 + $0x288] sm:$0xff]  ;;  %v297_v40 = vld [vmem:[%s4591_s1 + $0x1f0] sm:$0xff]  ;;  %v2745_v43 = vpack.c.bf16 %v280_v33, %v279_v31  ;;  %v2717_v44 = vpack.c.bf16 %v250_v36, %v249_v35 }
  0x1a   :  { %2738 = vmatpush3.bf16.msra.mxu1 %v2737_v15  ;;  %v298_v42 = vld [vmem:[%s4591_s1 + $0x1f8] sm:$0xff]  ;;  %v281_v45 = vld [vmem:[%s4591_s1 + $0x170] sm:$0xff]  ;;  %v2751_v47 = vpack.c.bf16 %v316_v39, %v315_v38  ;;  %v347_v49 = vld [vmem:[%s4591_s1 + $0x380] sm:$0xff] }
  0x1b   :  { %105 = vrot.lane.b32.xlu0 %v3190_v1, %s3132_s9  ;;  %2710 = vmatpush3.bf16.msra.mxu0 %v2709_v18  ;;  %v282_v46 = vld [vmem:[%s4591_s1 + $0x178] sm:$0xff]  ;;  %v2747_v48 = vpack.c.bf16 %v298_v42, %v297_v40  ;;  %v348_v50 = vld [vmem:[%s4591_s1 + $0x388] sm:$0xff]  ;;  %v299_v58 = vld [vmem:[%s4591_s1 + $0x200] sm:$0xff] }
  0x1c   :  { %2712 = vmatprep.subr.bf16.mxu0 %v2711_v21  ;;  %2740 = vmatprep.subr.bf16.mxu1 %v2739_v24  ;;  %v2749_v51 = vpack.c.bf16 %v282_v46, %v281_v45  ;;  %v2783_v52 = vpack.c.bf16 %v348_v50, %v347_v49  ;;  %v3444_v53 = vld [vmem:[#allocation2 + $0x2] sm:$0xff]  ;;  %v3450_v54 = vld [vmem:[#allocation2 + $0xa] sm:$0xff]  ;;  %v3456_v55 = vld [vmem:[#allocation2 + $0x1a] sm:$0xff] }
  0x1d   :  { %117 = vrot.lane.b32.xlu1 %v3190_v1, %s3133_s24  ;;  %v3462_v56 = vld [vmem:[#allocation2 + $0x22] sm:$0xff]  ;;  %v317_v61 = vld [vmem:[%s4591_s1 + $0x290] sm:$0xff]  ;;  %v318_v62 = vld [vmem:[%s4591_s1 + $0x298] sm:$0xff] }
  0x1e   :  { %2742 = vmatpush3.bf16.msra.mxu1 %v2741_v29  ;;  %v300_v60 = vld [vmem:[%s4591_s1 + $0x208] sm:$0xff]  ;;  %v2755_v6 = vpack.c.bf16 %v318_v62, %v317_v61  ;;  %v301_v7 = vld [vmem:[%s4591_s1 + $0x210] sm:$0xff]  ;;  %v302_v8 = vld [vmem:[%s4591_s1 + $0x218] sm:$0xff] }
  0x1f   :  { %107 = vrot.lane.b32.xlu0 %v3195_v2, %s3132_s9  ;;  %2714 = vmatpush3.bf16.msra.mxu0 %v2713_v30  ;;  %v2753_v4 = vpack.c.bf16 %v300_v60, %v299_v58  ;;  %v331_v9 = vld [vmem:[%s4591_s1 + $0x300] sm:$0xff]  ;;  %v332_v13 = vld [vmem:[%s4591_s1 + $0x308] sm:$0xff]  ;;  %v349_v17 = vld [vmem:[%s4591_s1 + $0x390] sm:$0xff]  ;;  %v2757_v21 = vpack.c.bf16 %v302_v8, %v301_v7 }
  0x20   :  { %2716 = vmatprep.subr.bf16.mxu0 %v2715_v34  ;;  %2744 = vmatprep.subr.bf16.mxu1 %v2743_v37  ;;  %v319_v14 = vld [vmem:[%s4591_s1 + $0x2a0] sm:$0xff]  ;;  %v320_v15 = vld [vmem:[%s4591_s1 + $0x2a8] sm:$0xff]  ;;  %v350_v18 = vld [vmem:[%s4591_s1 + $0x398] sm:$0xff]  ;;  %v2785_v23 = vpack.c.bf16 %v332_v13, %v331_v9 }
  0x21   :  { %119 = vrot.lane.b32.xlu1 %v3195_v2, %s3133_s24  ;;  %v2759_v24 = vpack.c.bf16 %v320_v15, %v319_v14  ;;  %v303_v25 = vld [vmem:[%s4591_s1 + $0x220] sm:$0xff]  ;;  %v304_v26 = vld [vmem:[%s4591_s1 + $0x228] sm:$0xff]  ;;  %v333_v27 = vld [vmem:[%s4591_s1 + $0x310] sm:$0xff]  ;;  %v2787_v29 = vpack.c.bf16 %v350_v18, %v349_v17 }
  0x22   :  { %2746 = vmatpush3.bf16.msra.mxu1 %v2745_v43  ;;  %v334_v30 = vld [vmem:[%s4591_s1 + $0x318] sm:$0xff]  ;;  %v321_v31 = vld [vmem:[%s4591_s1 + $0x2b0] sm:$0xff]  ;;  %v351_v36 = vld [vmem:[%s4591_s1 + $0x3a0] sm:$0xff]  ;;  %v2761_v38 = vpack.c.bf16 %v304_v26, %v303_v25 }
  0x23   :  { %109 = vrot.lane.b32.xlu0 %v3206_v3, %s3132_s9  ;;  %2718 = vmatpush3.bf16.msra.mxu0 %v2717_v44  ;;  %v322_v33 = vld [vmem:[%s4591_s1 + $0x2b8] sm:$0xff]  ;;  %v352_v37 = vld [vmem:[%s4591_s1 + $0x3a8] sm:$0xff]  ;;  %v2789_v42 = vpack.c.bf16 %v334_v30, %v333_v27  ;;  %v305_v44 = vld [vmem:[%s4591_s1 + $0x230] sm:$0xff] }
  0x24   :  { %2752 = vmatprep.subr.bf16.mxu0 %v2751_v47  ;;  %2748 = vmatprep.subr.bf16.mxu1 %v2747_v48  ;;  %v2763_v43 = vpack.c.bf16 %v322_v33, %v321_v31  ;;  %v306_v45 = vld [vmem:[%s4591_s1 + $0x238] sm:$0xff]  ;;  %v2791_v46 = vpack.c.bf16 %v352_v37, %v351_v36  ;;  %v335_v47 = vld [vmem:[%s4591_s1 + $0x320] sm:$0xff]  ;;  %v336_v48 = vld [vmem:[%s4591_s1 + $0x328] sm:$0xff] }
  0x25   :  { %121 = vrot.lane.b32.xlu1 %v3206_v3, %s3133_s24  ;;  %v323_v50 = vld [vmem:[%s4591_s1 + $0x2c0] sm:$0xff]  ;;  %v354_v58 = vld [vmem:[%s4591_s1 + $0x3b8] sm:$0xff]  ;;  %v2793_v61 = vpack.c.bf16 %v336_v48, %v335_v47  ;;  %v308_v62 = vld [vmem:[%s4591_s1 + $0x248] sm:$0xff] }
  0x26   :  { %2750 = vmatpush3.bf16.msra.mxu1 %v2749_v51  ;;  %v2765_v51 = vpack.c.bf16 %v306_v45, %v305_v44  ;;  %v338_v7 = vld [vmem:[%s4591_s1 + $0x338] sm:$0xff]  ;;  %v325_v8 = vld [vmem:[%s4591_s1 + $0x2d0] sm:$0xff]  ;;  %v355_v14 = vld [vmem:[%s4591_s1 + $0x3c0] sm:$0xff] }
  0x27   :  { %155 = vrot.lane.b32.xlu0 %v3444_v53, %s3132_s9  ;;  %2784 = vmatprep.subr.bf16.mxu1 %v2783_v52  ;;  %v326_v9 = vld [vmem:[%s4591_s1 + $0x2d8] sm:$0xff]  ;;  %v356_v15 = vld [vmem:[%s4591_s1 + $0x3c8] sm:$0xff]  ;;  %v327_v25 = vld [vmem:[%s4591_s1 + $0x2e0] sm:$0xff] }
  0x28   :  { %v328_v26 = vld [vmem:[%s4591_s1 + $0x2e8] sm:$0xff]  ;;  %v311_v37 = vld [vmem:[%s4591_s1 + $0x260] sm:$0xff] }
  0x29   :  { %167 = vrot.lane.b32.xlu1 %v3444_v53, %s3133_s24  ;;  %v359_v45 = vld [vmem:[%s4591_s1 + $0x3e0] sm:$0xff] }
  0x2b   :  { %157 = vrot.lane.b32.xlu0 %v3450_v54, %s3132_s9 }
  0x2d   :  { %169 = vrot.lane.b32.xlu1 %v3450_v54, %s3133_s24 }
  0x2f   :  { %159 = vrot.lane.b32.xlu0 %v3456_v55, %s3132_s9 }
  0x31   :  { %171 = vrot.lane.b32.xlu1 %v3456_v55, %s3133_s24 }
  0x33   :  { %161 = vrot.lane.b32.xlu0 %v3462_v56, %s3132_s9 }
  0x35   :  { %173 = vrot.lane.b32.xlu1 %v3462_v56, %s3133_s24 }
  0x7d   :  { %v50_v57 = vpop.permute.xlu0 %49 }
  0x7f   :  { %v3482_v63 = vpop.permute.xlu1 %3109 }
  0x80   :  { %v3112_v10 = vunpack.i.h.bf16 %v3482_v63  ;;  %v3111_v11 = vunpack.i.l.bf16 %v3482_v63 }
  0x81   :  { %v62_v5 = vpop.permute.xlu0 %61 }
  0x82   :  { %v74_v12 = vsel %vm73_vm0, %v50_v57, %v62_v5  ;;  %v79_v35 = vsel %vm78_vm1, %v50_v57, %v62_v5  ;;  %v353_v57 = vld [vmem:[%s4591_s1 + $0x3b0] sm:$0xff] }
  0x83   :  { %v3505_v16 = vpop.permute.xlu1 %3114  ;;  %444 = vmatmul.mubr.f32.vlgmr.msra.gmra.mrb[0].mxu0 %v74_v12  ;;  %v337_v5 = vld [vmem:[%s4591_s1 + $0x330] sm:$0xff]  ;;  %v2795_v13 = vpack.c.bf16 %v354_v58, %v353_v57  ;;  %v314_v57 = vld [vmem:[%s4591_s1 + $0x278] sm:$0xff]  ;;  %v343_v58 = vld [vmem:[%s4591_s1 + $0x360] sm:$0xff] }
  0x84   :  { %v3117_v19 = vunpack.i.h.bf16 %v3505_v16  ;;  %v3116_v20 = vunpack.i.l.bf16 %v3505_v16  ;;  %2754 = vmatpush3.bf16.msra.mxu0 %v2753_v4  ;;  %448 = vmatprep.mubr.f32.mxu0 %v3270_v32  ;;  %v2797_v63 = vpack.c.bf16 %v338_v7, %v337_v5 }
  0x85   :  { %2756 = vmatprep.subr.bf16.mxu0 %v2755_v6  ;;  %v3516_v22 = vpop.permute.xlu0 %53 }
  0x86   :  { %v127_v32 = vsel %vm73_vm0, %v3112_v10, %v3117_v19  ;;  %v75_v28 = vsel %vm73_vm0, %v3111_v11, %v3116_v20  ;;  %v131_v4 = vsel %vm78_vm1, %v3112_v10, %v3117_v19  ;;  %v80_v10 = vsel %vm78_vm1, %v3111_v11, %v3116_v20  ;;  %v309_v19 = vld [vmem:[%s4591_s1 + $0x250] sm:$0xff]  ;;  %v310_v20 = vld [vmem:[%s4591_s1 + $0x258] sm:$0xff] }
  0x87   :  { %v3544_v34 = vpop.permute.xlu1 %65  ;;  %528 = vmatprep.mubr.f32.mxu1 %v127_v32  ;;  %449 = vmatmul.mubr.f32.gmra.mrb[2].mxu0 %v75_v28  ;;  %v2771_v11 = vpack.c.bf16 %v326_v9, %v325_v8  ;;  %v357_v32 = vld [vmem:[%s4591_s1 + $0x3d0] sm:$0xff]  ;;  %v358_v28 = vld [vmem:[%s4591_s1 + $0x3d8] sm:$0xff] }
  0x88   :  { %2758 = vmatpush3.bf16.msra.mxu0 %v2757_v21  ;;  %529 = vmatmul.mubr.f32.vlgmr.msra.gmra.mrb[0].mxu1 %v79_v35  ;;  %v76_v39 = vsel %vm73_vm0, %v3516_v22, %v3544_v34  ;;  %v339_v21 = vld [vmem:[%s4591_s1 + $0x340] sm:$0xff]  ;;  %v81_v31 = vsel %vm78_vm1, %v3516_v22, %v3544_v34  ;;  %v2775_v35 = vpack.c.bf16 %v328_v26, %v327_v25  ;;  %v342_v34 = vld [vmem:[%s4591_s1 + $0x358] sm:$0xff] }
  0x89   :  { %2786 = vmatpush3.bf16.msra.mxu1 %v2785_v23  ;;  %2760 = vmatprep.subr.bf16.mxu0 %v2759_v24  ;;  %v3556_v40 = vpop.permute.xlu0 %55  ;;  %v2799_v23 = vpack.c.bf16 %v356_v15, %v355_v14  ;;  %v340_v24 = vld [vmem:[%s4591_s1 + $0x348] sm:$0xff]  ;;  %v2803_v22 = vpack.c.bf16 %v358_v28, %v357_v32  ;;  %v346_v14 = vld [vmem:[%s4591_s1 + $0x378] sm:$0xff]  ;;  %v365_v15 = vld [vmem:[%s4591_s1 + $0x410] sm:$0xff] }
  0x8a   :  { %2788 = vmatprep.subr.bf16.mxu1 %v2787_v29  ;;  %453 = vmatprep.mubr.f32.mxu0 %v3288_v41  ;;  %v324_v41 = vld [vmem:[%s4591_s1 + $0x2c8] sm:$0xff]  ;;  %v2773_v29 = vpack.c.bf16 %v310_v20, %v309_v19  ;;  %v2801_v33 = vpack.c.bf16 %v340_v24, %v339_v21  ;;  %v367_v20 = vld [vmem:[%s4591_s1 + $0x420] sm:$0xff]  ;;  %v370_v24 = vld [vmem:[%s4591_s1 + $0x438] sm:$0xff] }
  0x8b   :  { %v3571_v49 = vpop.permute.xlu1 %67  ;;  %454 = vmatmul.mubr.f32.gmra.mrb[4].mxu0 %v76_v39  ;;  %v2767_v6 = vpack.c.bf16 %v324_v41, %v323_v50  ;;  %v341_v39 = vld [vmem:[%s4591_s1 + $0x350] sm:$0xff]  ;;  %v368_v21 = vld [vmem:[%s4591_s1 + $0x428] sm:$0xff]  ;;  %v371_v32 = vld [vmem:[%s4591_s1 + $0x440] sm:$0xff] }
  0x8c   :  { %2762 = vmatpush3.bf16.msra.mxu0 %v2761_v38  ;;  %458 = vmatprep.mubr.f32.mxu0 %v3328_v59  ;;  %v77_v52 = vsel %vm73_vm0, %v3556_v40, %v3571_v49  ;;  %v307_v59 = vld [vmem:[%s4591_s1 + $0x240] sm:$0xff]  ;;  %v312_v38 = vld [vmem:[%s4591_s1 + $0x268] sm:$0xff]  ;;  %v82_v50 = vsel %vm78_vm1, %v3556_v40, %v3571_v49  ;;  %v2805_v41 = vpack.c.bf16 %v342_v34, %v341_v39  ;;  %v378_v39 = vld [vmem:[%s4591_s1 + $0x478] sm:$0xff] }
  0x8d   :  { %2790 = vmatpush3.bf16.msra.mxu1 %v2789_v42  ;;  %2764 = vmatprep.subr.bf16.mxu0 %v2763_v43  ;;  %v3589_v60 = vpop.permute.xlu0 %105  ;;  %v2769_v18 = vpack.c.bf16 %v308_v62, %v307_v59  ;;  %v329_v42 = vld [vmem:[%s4591_s1 + $0x2f0] sm:$0xff]  ;;  %v330_v43 = vld [vmem:[%s4591_s1 + $0x2f8] sm:$0xff]  ;;  %v2777_v47 = vpack.c.bf16 %v312_v38, %v311_v37  ;;  %v344_v40 = vld [vmem:[%s4591_s1 + $0x368] sm:$0xff] }
  0x8e   :  { %2792 = vmatprep.subr.bf16.mxu1 %v2791_v46  ;;  %v360_v46 = vld [vmem:[%s4591_s1 + $0x3e8] sm:$0xff]  ;;  %v363_v49 = vld [vmem:[%s4591_s1 + $0x400] sm:$0xff]  ;;  %v361_v62 = vld [vmem:[%s4591_s1 + $0x3f0] sm:$0xff]  ;;  %v2809_v8 = vpack.c.bf16 %v344_v40, %v343_v58 }
  0x8f   :  { %v3612_v12 = vpop.permute.xlu1 %117  ;;  %459 = vmatmul.mubr.f32.gmra.mrb[6].mxu0 %v77_v52  ;;  %v313_v52 = vld [vmem:[%s4591_s1 + $0x270] sm:$0xff]  ;;  %v364_v59 = vld [vmem:[%s4591_s1 + $0x408] sm:$0xff]  ;;  %v375_v37 = vld [vmem:[%s4591_s1 + $0x460] sm:$0xff] }
  0x90   :  { %2766 = vmatpush3.bf16.msra.mxu0 %v2765_v51  ;;  %v128_v17 = vsel %vm73_vm0, %v3589_v60, %v3612_v12  ;;  %613 = vmatprep.mubr.f32.mxu0 %v131_v4  ;;  %v2779_v51 = vpack.c.bf16 %v330_v43, %v329_v42  ;;  %v362_v4 = vld [vmem:[%s4591_s1 + $0x3f8] sm:$0xff]  ;;  %v2781_v5 = vpack.c.bf16 %v314_v57, %v313_v52  ;;  %v372_v28 = vld [vmem:[%s4591_s1 + $0x448] sm:$0xff]  ;;  %v821_v58 = vld [vmem:[%s4592_s7 + $0x30] sm:$0xff] }
  0x91   :  { %2794 = vmatpush3.bf16.msra.mxu1 %v2793_v61  ;;  %533 = vmatprep.mubr.f32.mxu1 %v128_v17  ;;  %v3628_v16 = vpop.permute.xlu0 %107  ;;  %v2807_v61 = vpack.c.bf16 %v360_v46, %v359_v45  ;;  %v2815_v9 = vpack.c.bf16 %v364_v59, %v363_v49  ;;  %v376_v38 = vld [vmem:[%s4591_s1 + $0x468] sm:$0xff]  ;;  %v815_v45 = vld [vmem:[%s4592_s7] sm:$0xff] }
  0x92   :  { %534 = vmatmul.mubr.f32.gmra.mrb[2].mxu1 %v80_v10  ;;  %2768 = vmatprep.subr.bf16.mxu0 %v2767_v6  ;;  %v345_v10 = vld [vmem:[%s4591_s1 + $0x370] sm:$0xff]  ;;  %v816_v46 = vld [vmem:[%s4592_s7 + $0x8] sm:$0xff]  ;;  %v823_v49 = vld [vmem:[%s4592_s7 + $0x40] sm:$0xff] }
  0x93   :  { %2796 = vmatprep.subr.bf16.mxu1 %v2795_v13  ;;  %v3648_v27 = vpop.permute.xlu1 %119  ;;  %v2811_v13 = vpack.c.bf16 %v362_v4, %v361_v62  ;;  %v2813_v17 = vpack.c.bf16 %v346_v14, %v345_v10  ;;  %v820_v52 = vld [vmem:[%s4592_s7 + $0x28] sm:$0xff]  ;;  %v825_v4 = vld [vmem:[%s4592_s7 + $0x50] sm:$0xff] }
  0x94   :  { %2770 = vmatpush3.bf16.msra.mxu0 %v2769_v18  ;;  %v129_v30 = vsel %vm73_vm0, %v3628_v16, %v3648_v27  ;;  %v132_v18 = vsel %vm78_vm1, %v3589_v60, %v3612_v12  ;;  %v133_v12 = vsel %vm78_vm1, %v3628_v16, %v3648_v27  ;;  %v824_v59 = vld [vmem:[%s4592_s7 + $0x48] sm:$0xff]  ;;  %v829_v10 = vld [vmem:[%s4592_s7 + $0x70] sm:$0xff] }
  0x95   :  { %2798 = vmatpush3.bf16.msra.mxu1 %v2797_v63  ;;  %2772 = vmatprep.subr.bf16.mxu0 %v2771_v11  ;;  %v3662_v36 = vpop.permute.xlu0 %109  ;;  %v2860_v62 = vpack.c.bf16 %v824_v59, %v823_v49 }
  0x96   :  { %2800 = vmatprep.subr.bf16.mxu1 %v2799_v23  ;;  %538 = vmatprep.mubr.f32.mxu1 %v129_v30  ;;  %v2823_v23 = vpack.c.bf16 %v368_v21, %v367_v20 }
  0x97   :  { %539 = vmatmul.mubr.f32.gmra.mrb[4].mxu1 %v81_v31  ;;  %v3682_v44 = vpop.permute.xlu1 %121 }
  0x98   :  { %2774 = vmatpush3.bf16.msra.mxu0 %v2773_v29  ;;  %v130_v48 = vsel %vm73_vm0, %v3662_v36, %v3682_v44  ;;  %v2831_v29 = vpack.c.bf16 %v372_v28, %v371_v32 }
  0x99   :  { %2802 = vmatpush3.bf16.msra.mxu1 %v2801_v33  ;;  %2776 = vmatprep.subr.bf16.mxu0 %v2775_v35  ;;  %v156_v7 = vpop.permute.xlu0 %155  ;;  %v373_v33 = vld [vmem:[%s4591_s1 + $0x450] sm:$0xff]  ;;  %v374_v35 = vld [vmem:[%s4591_s1 + $0x458] sm:$0xff] }
  0x9a   :  { %2804 = vmatprep.subr.bf16.mxu1 %v2803_v22  ;;  %543 = vmatprep.mubr.f32.mxu1 %v130_v48  ;;  %v2848_v48 = vpack.c.bf16 %v816_v46, %v815_v45 }
  0x9b   :  { %544 = vmatmul.mubr.f32.gmra.mrb[6].mxu1 %v82_v50  ;;  %v168_v6 = vpop.permute.xlu1 %167  ;;  %v818_v50 = vld [vmem:[%s4592_s7 + $0x18] sm:$0xff] }
  0x9c   :  { %2778 = vmatpush3.bf16.msra.mxu0 %v2777_v47  ;;  %698 = vmatprep.mubr.f32.mxu1 %v3444_v53  ;;  %v366_v53 = vld [vmem:[%s4591_s1 + $0x418] sm:$0xff]  ;;  %v179_v60 = vsel %vm73_vm0, %v156_v7, %v168_v6  ;;  %v817_v47 = vld [vmem:[%s4592_s7 + $0x10] sm:$0xff] }
  0x9d   :  { %2806 = vmatpush3.bf16.msra.mxu1 %v2805_v41  ;;  %2780 = vmatprep.subr.bf16.mxu0 %v2779_v51  ;;  %v2819_v63 = vpack.c.bf16 %v366_v53, %v365_v15  ;;  %v158_v19 = vpop.permute.xlu0 %157  ;;  %v2851_v41 = vpack.c.bf16 %v818_v50, %v817_v47  ;;  %v819_v51 = vld [vmem:[%s4592_s7 + $0x20] sm:$0xff]  ;;  %v3136_v15 = vmov 0.0  }
  0x9e   :  { %2808 = vmatprep.subr.bf16.mxu1 %v2807_v61  ;;  %v2854_v57 = vpack.c.bf16 %v820_v52, %v819_v51  ;;  %v822_v61 = vld [vmem:[%s4592_s7 + $0x38] sm:$0xff] }
  0x9f   :  { %v3736_v11 = vpop.permute.xlu1 %169  ;;  %v2857_v40 = vpack.c.bf16 %v822_v61, %v821_v58 }
  0xa0   :  { %2782 = vmatpush3.bf16.msra.mxu0 %v2781_v5  ;;  %v180_v16 = vsel %vm73_vm0, %v158_v19, %v3736_v11  ;;  %v184_v34 = vsel %vm78_vm1, %v158_v19, %v3736_v11  ;;  %v826_v5 = vld [vmem:[%s4592_s7 + $0x58] sm:$0xff] }
  0xa1   :  { %2810 = vmatpush3.bf16.msra.mxu1 %v2809_v8  ;;  %2816 = vmatprep.subr.bf16.mxu0 %v2815_v9  ;;  %v160_v26 = vpop.permute.xlu0 %159  ;;  %v828_v8 = vld [vmem:[%s4592_s7 + $0x68] sm:$0xff] }
  0xa2   :  { %2812 = vmatprep.subr.bf16.mxu1 %v2811_v13  ;;  %v830_v13 = vld [vmem:[%s4592_s7 + $0x78] sm:$0xff] }
  0xa3   :  { %614 = vmatmul.mubr.f32.vlgmr.msra.gmra.mrb[8].mxu0 %v3185_v0  ;;  %v369_v0 = vld [vmem:[%s4591_s1 + $0x430] sm:$0xff]  ;;  %v172_v25 = vpop.permute.xlu1 %171  ;;  %v2869_v14 = vpack.c.bf16 %v830_v13, %v829_v10 }
  0xa4   :  { %2818 = vmatpush3.bf16.msra.mxu0 %v2815_v9  ;;  %618 = vmatprep.mubr.f32.mxu0 %v132_v18  ;;  %v2827_v27 = vpack.c.bf16 %v370_v24, %v369_v0  ;;  %v185_v42 = vsel %vm78_vm1, %v160_v26, %v172_v25 }
  0xa5   :  { %2814 = vmatpush3.bf16.msra.mxu1 %v2813_v17  ;;  %2820 = vmatprep.subr.bf16.mxu0 %v2819_v63  ;;  %v162_v31 = vpop.permute.xlu0 %161 }
  0xa7   :  { %619 = vmatmul.mubr.f32.gmra.mrb[10].mxu0 %v3190_v1  ;;  %v134_v1 = vsel %vm78_vm1, %v3662_v36, %v3682_v44  ;;  %v174_v30 = vpop.permute.xlu1 %173  ;;  %v2835_v36 = vpack.c.bf16 %v374_v35, %v373_v33  ;;  %v3134_v44 = vmov 0.0|0.0  }
  0xa8   :  { %699 = vmatmul.mubr.f32.vlgmr.msra.gmra.mrb[8].mxu1 %v179_v60  ;;  %2822 = vmatpush3.bf16.msra.mxu0 %v2819_v63  ;;  %v186_v43 = vsel %vm78_vm1, %v162_v31, %v174_v30 }
  0xa9   :  { %623 = vmatprep.mubr.f32.mxu0 %v133_v12  ;;  %703 = vmatprep.mubr.f32.mxu1 %v3450_v54  ;;  %v181_v54 = vsel %vm73_vm0, %v160_v26, %v172_v25 }
  0xaa   :  { %2824 = vmatprep.subr.bf16.mxu0 %v2823_v23  ;;  %2847 = vmatprep.subr.bf16.mxu1 %v3134_v44 }
  0xab   :  { %624 = vmatmul.mubr.f32.gmra.mrb[12].mxu0 %v3195_v2  ;;  %v183_v2 = vsel %vm78_vm1, %v156_v7, %v168_v6  ;;  %2849 = vmatpush3.bf16.msra.mxu1 %v2848_v48  ;;  %v2863_v6 = vpack.c.bf16 %v826_v5, %v825_v4  ;;  %v827_v7 = vld [vmem:[%s4592_s7 + $0x60] sm:$0xff] }
  0xac   :  { %704 = vmatmul.mubr.f32.gmra.mrb[10].mxu1 %v180_v16  ;;  %2826 = vmatpush3.bf16.msra.mxu0 %v2823_v23  ;;  %v2866_v9 = vpack.c.bf16 %v828_v8, %v827_v7 }
  0xad   :  { %628 = vmatprep.mubr.f32.mxu0 %v134_v1  ;;  %708 = vmatprep.mubr.f32.mxu1 %v3456_v55  ;;  %v182_v55 = vsel %vm73_vm0, %v162_v31, %v174_v30 }
  0xae   :  { %2828 = vmatprep.subr.bf16.mxu0 %v2827_v27  ;;  %2850 = vmatprep.subr.bf16.mxu1 %v3134_v44 }
  0xaf   :  { %629 = vmatmul.mubr.f32.gmra.mrb[14].mxu0 %v3206_v3  ;;  %v2839_v3 = vpack.c.bf16 %v376_v38, %v375_v37  ;;  %2852 = vmatpush3.bf16.msra.mxu1 %v2851_v41 }
  0xb0   :  { %709 = vmatmul.mubr.f32.gmra.mrb[12].mxu1 %v181_v54  ;;  %2830 = vmatpush3.bf16.msra.mxu0 %v2827_v27 }
  0xb1   :  { %713 = vmatprep.mubr.f32.mxu1 %v3462_v56  ;;  %2832 = vmatprep.subr.bf16.mxu0 %v2831_v29  ;;  %v377_v56 = vld [vmem:[%s4591_s1 + $0x470] sm:$0xff] }
  0xb2   :  { %2503 = vmatprep.mubr.f32.mxu0 %v183_v2  ;;  %v2843_v22 = vpack.c.bf16 %v378_v39, %v377_v56  ;;  %2853 = vmatprep.subr.bf16.mxu1 %v3134_v44 }
  0xb3   :  { %2855 = vmatpush3.bf16.msra.mxu1 %v2854_v57 }
  0xb4   :  { %714 = vmatmul.mubr.f32.gmra.mrb[14].mxu1 %v182_v55  ;;  %2834 = vmatpush3.bf16.msra.mxu0 %v2831_v29 }
  0xb5   :  { %2836 = vmatprep.subr.bf16.mxu0 %v2835_v36  ;;  %2856 = vmatprep.subr.bf16.mxu1 %v3134_v44 }
  0xb6   :  { %2541 = vmatprep.mubr.msk.f32.mxu1 %vm3135_vm2, %v3136_v15 }
  0xb7   :  { %2858 = vmatpush3.bf16.msra.mxu1 %v2857_v40 }
  0xb8   :  { %2838 = vmatpush3.bf16.msra.mxu0 %v2835_v36  ;;  %2859 = vmatprep.subr.bf16.mxu1 %v3134_v44 }
  0xb9   :  { %2840 = vmatprep.subr.bf16.mxu0 %v2839_v3 }
  0xbb   :  { %2861 = vmatpush3.bf16.msra.mxu1 %v2860_v62 }
  0xbc   :  { %2842 = vmatpush3.bf16.msra.mxu0 %v2839_v3  ;;  %2862 = vmatprep.subr.bf16.mxu1 %v3134_v44 }
  0xbd   :  { %2844 = vmatprep.subr.bf16.mxu0 %v2843_v22 }
  0xbf   :  { %2864 = vmatpush3.bf16.msra.mxu1 %v2863_v6 }
  0xc0   :  { %2846 = vmatpush3.bf16.msra.mxu0 %v2843_v22  ;;  %2865 = vmatprep.subr.bf16.mxu1 %v3134_v44 }
  0xc1   :  { %2871 = vmatprep.subr.bf16.mxu0 %v3134_v44 }
  0xc3   :  { %2504 = vmatmul.mubr.f32.vlgmr.msra.gmra.mrb[16].mxu0 %v184_v34  ;;  %2867 = vmatpush3.bf16.msra.mxu1 %v2866_v9 }
  0xc4   :  { %2506 = vmatprep.mubr.f32.mxu0 %v185_v42  ;;  %2873 = vmatpush3.bf16.msra.mxu0 %v2848_v48 }
  0xc5   :  { %2874 = vmatprep.subr.bf16.mxu0 %v3134_v44  ;;  %2868 = vmatprep.subr.bf16.mxu1 %v3134_v44 }
  0xc7   :  { %2507 = vmatmul.mubr.f32.gmra.mrb[18].mxu0 %v186_v43  ;;  %2870 = vmatpush3.bf16.msra.mxu1 %v2869_v14 }
  0xc8   :  { %2876 = vmatpush3.bf16.msra.mxu0 %v2851_v41  ;;  %2576 = vmatprep.mubr.msk.f32.mxu0 %vm3135_vm2, %v3136_v15 }
  0xc9   :  { %2877 = vmatprep.subr.bf16.mxu0 %v3134_v44 }
  0xcc   :  { %2879 = vmatpush3.bf16.msra.mxu0 %v2854_v57 }
  0xcd   :  { %2880 = vmatprep.subr.bf16.mxu0 %v3134_v44 }
  0xd0   :  { %2882 = vmatpush3.bf16.msra.mxu0 %v2857_v40 }
  0xd1   :  { %2883 = vmatprep.subr.bf16.mxu0 %v3134_v44 }
  0xd4   :  { %2885 = vmatpush3.bf16.msra.mxu0 %v2860_v62 }
  0xd5   :  { %2886 = vmatprep.subr.bf16.mxu0 %v3134_v44 }
  0xd8   :  { %2888 = vmatpush3.bf16.msra.mxu0 %v2863_v6 }
  0xd9   :  { %2889 = vmatprep.subr.bf16.mxu0 %v3134_v44 }
  0xdc   :  { %2891 = vmatpush3.bf16.msra.mxu0 %v2866_v9 }
  0xdd   :  { %2892 = vmatprep.subr.bf16.mxu0 %v3134_v44 }
  0xe0   :  { %2894 = vmatpush3.bf16.msra.mxu0 %v2869_v14 }
 0x156   :  { %v2043_v53 = vpop.f32.mrb[0].mxu0 }
 0x157   :  { %v2044_v17 = vpop.f32.mrb[1].mxu0 }
 0x158   :  { %v2045_v18 = vadd.f32 %v2044_v17, %v2043_v53 }
 0x15a   :  { %v2046_v63 = vpop.f32.mrb[2].mxu0 }
 0x15b   :  { %v2087_v11 = vpop.f32.mrb[0].mxu1  ;;  %v2047_v19 = vpop.f32.mrb[3].mxu0 }
 0x15c   :  { %v2088_v20 = vpop.f32.mrb[1].mxu1  ;;  %v2048_v21 = vadd.f32 %v2047_v19, %v2046_v63 }
 0x15d   :  { %v2089_v60 = vadd.f32 %v2088_v20, %v2087_v11 }
 0x15e   :  { %v2049_v12 = vpop.f32.mrb[4].mxu0 }
 0x15f   :  { %v531_v23 = vadd.f32 %v2089_v60, %v2045_v18  ;;  %v2050_v0 = vpop.f32.mrb[5].mxu0 }
 0x160   :  { %v2051_v24 = vadd.f32 %v2050_v0, %v2049_v12 }
 0x162   :  { %v2052_v25 = vpop.f32.mrb[6].mxu0 }
 0x163   :  { %v2053_v26 = vpop.f32.mrb[7].mxu0 }
 0x164   :  { %v2054_v16 = vadd.f32 %v2053_v26, %v2052_v25 }
 0x165   :  { %v2090_v1 = vpop.f32.mrb[2].mxu1 }
 0x166   :  { %v2091_v27 = vpop.f32.mrb[3].mxu1 }
 0x167   :  { %v2092_v32 = vadd.f32 %v2091_v27, %v2090_v1 }
 0x169   :  { %v536_v28 = vadd.f32 %v2092_v32, %v2048_v21 }
 0x16a   :  { %v2093_v54 = vpop.f32.mrb[4].mxu1 }
 0x16b   :  { %v2094_v29 = vpop.f32.mrb[5].mxu1 }
 0x16c   :  { %v2095_v30 = vadd.f32 %v2094_v29, %v2093_v54 }
 0x16e   :  { %v541_v31 = vadd.f32 %v2095_v30, %v2051_v24  ;;  %v2096_v33 = vpop.f32.mrb[6].mxu1 }
 0x16f   :  { %v2097_v35 = vpop.f32.mrb[7].mxu1 }
 0x170   :  { %v2098_v2 = vadd.f32 %v2097_v35, %v2096_v33 }
 0x172   :  { %v546_v55 = vadd.f32 %v2098_v2, %v2054_v16  ;;  %v901_v16 = vlaneseq }
 0x174   :  { %v902_v1 = vshrl.u32 %v901_v16, 7  ;;  %v1253_v16 = vld [vmem:[%s4593_s2 + $0x128] sm:$0xff] }
 0x176   :  { %v2131_v36 = vpop.f32.mrb[8].mxu0  ;;  %v3865_v27 = vsub.s32 0, %v902_v1  ;;  %v1240_v1 = vld [vmem:[%s4593_s2 + $0xc0] sm:$0xff] }
 0x177   :  { %v2132_v37 = vpop.f32.mrb[9].mxu0 }
 0x178   :  { %v2133_v38 = vadd.f32 %v2132_v37, %v2131_v36 }
 0x17a   :  { %v616_v3 = vadd.f32 %v2133_v38, %v531_v23  ;;  %v2134_v56 = vpop.f32.mrb[10].mxu0 }
 0x17b   :  { %v2135_v39 = vpop.f32.mrb[11].mxu0  ;;  %v2175_v22 = vpop.f32.mrb[8].mxu1 }
 0x17c   :  { %v2136_v34 = vadd.f32 %v2135_v39, %v2134_v56  ;;  %v2176_v42 = vpop.f32.mrb[9].mxu1 }
 0x17d   :  { %v2177_v43 = vadd.f32 %v2176_v42, %v2175_v22 }
 0x17e   :  { %v621_v45 = vadd.f32 %v2136_v34, %v536_v28  ;;  %v2137_v46 = vpop.f32.mrb[12].mxu0 }
 0x17f   :  { %v2138_v47 = vpop.f32.mrb[13].mxu0  ;;  %v2178_v48 = vpop.f32.mrb[10].mxu1  ;;  %v701_v50 = vadd.f32 %v2177_v43, %v616_v3 }
 0x180   :  { %v2139_v41 = vadd.f32 %v2138_v47, %v2137_v46  ;;  %v2179_v51 = vpop.f32.mrb[11].mxu1  ;;  %v1233_v46 = vld [vmem:[%s4593_s2 + $0x88] sm:$0xff]  ;;  %v1216_v47 = vld [vmem:[%s4593_s2] sm:$0xff] }
 0x181   :  { %v2180_v52 = vadd.f32 %v2179_v51, %v2178_v48  ;;  %v1235_v51 = vld [vmem:[%s4593_s2 + $0x98] sm:$0xff] }
 0x182   :  { %v626_v57 = vadd.f32 %v2139_v41, %v541_v31  ;;  %v2140_v58 = vpop.f32.mrb[14].mxu0  ;;  %v1234_v41 = vld [vmem:[%s4593_s2 + $0x90] sm:$0xff] }
 0x183   :  { %v2141_v61 = vpop.f32.mrb[15].mxu0  ;;  %v2181_v40 = vpop.f32.mrb[12].mxu1  ;;  %v706_v49 = vadd.f32 %v2180_v52, %v621_v45  ;;  %v1232_v45 = vld [vmem:[%s4593_s2 + $0x80] sm:$0xff] }
 0x184   :  { %v2142_v59 = vadd.f32 %v2141_v61, %v2140_v58  ;;  %v2182_v62 = vpop.f32.mrb[13].mxu1  ;;  %v2895_v48 = vpack.c.bf16 %v1233_v46, %v1232_v45  ;;  %v1218_v58 = vld [vmem:[%s4593_s2 + $0x10] sm:$0xff]  ;;  %v1219_v61 = vld [vmem:[%s4593_s2 + $0x18] sm:$0xff] }
 0x185   :  { %v2183_v4 = vadd.f32 %v2182_v62, %v2181_v40  ;;  %v1264_v40 = vld [vmem:[%s4593_s2 + $0x180] sm:$0xff]  ;;  %v1237_v62 = vld [vmem:[%s4593_s2 + $0xa8] sm:$0xff]  ;;  %v1226_v46 = vld [vmem:[%s4593_s2 + $0x50] sm:$0xff] }
 0x186   :  { %v631_v5 = vadd.f32 %v2142_v59, %v546_v55  ;;  %2896 = vmatprep.subr.bf16.mxu1 %v2895_v48  ;;  %v1236_v59 = vld [vmem:[%s4593_s2 + $0xa0] sm:$0xff] }
 0x187   :  { %v2184_v6 = vpop.f32.mrb[14].mxu1  ;;  %v711_v7 = vadd.f32 %v2183_v4, %v626_v57  ;;  %v2899_v57 = vpack.c.bf16 %v1235_v51, %v1234_v41  ;;  %v2901_v4 = vpack.c.bf16 %v1219_v61, %v1218_v58  ;;  %v1256_v48 = vld [vmem:[%s4593_s2 + $0x140] sm:$0xff]  ;;  %v1227_v51 = vld [vmem:[%s4593_s2 + $0x58] sm:$0xff]  ;;  %v1245_v61 = vld [vmem:[%s4593_s2 + $0xe8] sm:$0xff] }
 0x188   :  { %v2185_v8 = vpop.f32.mrb[15].mxu1  ;;  %v1244_v58 = vld [vmem:[%s4593_s2 + $0xe0] sm:$0xff] }
 0x189   :  { %v2186_v9 = vadd.f32 %v2185_v8, %v2184_v6  ;;  %v1248_v6 = vld [vmem:[%s4593_s2 + $0x100] sm:$0xff] }
 0x18a   :  { %v1220_v8 = vld [vmem:[%s4593_s2 + $0x20] sm:$0xff] }
 0x18b   :  { %v716_v10 = vadd.f32 %v2186_v9, %v631_v5  ;;  %v2903_v9 = vpack.c.bf16 %v1237_v62, %v1236_v59  ;;  %v1228_v59 = vld [vmem:[%s4593_s2 + $0x60] sm:$0xff] }
 0x196   :  { %v2505_v13 = vpop.f32.mrb[16].mxu0 }
 0x197   :  { %v791_v14 = vadd.f32 %v2505_v13, %v706_v49  ;;  %v785_v53 = vpop.f32.mrb[17].mxu0  ;;  %v1265_v49 = vld [vmem:[%s4593_s2 + $0x188] sm:$0xff] }
 0x198   :  { %v786_v17 = vadd.f32 %v785_v53, %v701_v50  ;;  %v1217_v50 = vld [vmem:[%s4593_s2 + $0x8] sm:$0xff]  ;;  %v2927_v5 = vpack.c.bf16 %v1265_v49, %v1264_v40  ;;  %v1267_v53 = vld [vmem:[%s4593_s2 + $0x198] sm:$0xff]  ;;  %v2917_v49 = vpack.c.bf16 %v1227_v51, %v1226_v46  ;;  %v1328_v46 = vld [vmem:[%s4593_s2 + $0x380] sm:$0xff] }
 0x199   :  { %v2897_v52 = vpack.c.bf16 %v1217_v50, %v1216_v47  ;;  %v1221_v13 = vld [vmem:[%s4593_s2 + $0x28] sm:$0xff] }
 0x19a   :  { %v2508_v18 = vpop.f32.mrb[18].mxu0  ;;  %v806_v19 = vadd.f32 %v791_v14, %v786_v17  ;;  %2928 = vmatprep.subr.bf16.mxu0 %v2927_v5  ;;  %v1257_v50 = vld [vmem:[%s4593_s2 + $0x148] sm:$0xff]  ;;  %v1259_v5 = vld [vmem:[%s4593_s2 + $0x158] sm:$0xff] }
 0x19b   :  { %v801_v63 = vadd.f32 %v2508_v18, %v716_v10  ;;  %v795_v11 = vpop.f32.mrb[19].mxu0  ;;  %v1238_v18 = vld [vmem:[%s4593_s2 + $0xb0] sm:$0xff]  ;;  %v2945_v40 = vpack.c.bf16 %v1257_v50, %v1256_v48 }
 0x19c   :  { %v796_v20 = vadd.f32 %v795_v11, %v711_v7  ;;  %v1249_v7 = vld [vmem:[%s4593_s2 + $0x108] sm:$0xff]  ;;  %v1250_v11 = vld [vmem:[%s4593_s2 + $0x110] sm:$0xff] }
 0x19d   :  { %v2929_v10 = vpack.c.bf16 %v1249_v7, %v1248_v6  ;;  %v2919_v6 = vpack.c.bf16 %v1245_v61, %v1244_v58  ;;  %v1229_v7 = vld [vmem:[%s4593_s2 + $0x68] sm:$0xff] }
 0x19e   :  { %v807_v21 = vadd.f32 %v806_v19, %v796_v20  ;;  %v1251_v19 = vld [vmem:[%s4593_s2 + $0x118] sm:$0xff] }
 0x1a0   :  { %v808_v60 = vadd.f32 %v807_v21, %v801_v63  ;;  %v2933_v21 = vpack.c.bf16 %v1251_v19, %v1250_v11  ;;  %v1231_v11 = vld [vmem:[%s4593_s2 + $0x78] sm:$0xff] }
 0x1a2   :  { %v809_v12 = vrot.slane %v808_v60, 4 }
 0x1a4   :  { %v810_v23 = vadd.f32 %v809_v12, %v808_v60  ;;  %v1222_v60 = vld [vmem:[%s4593_s2 + $0x30] sm:$0xff]  ;;  %v1268_v12 = vld [vmem:[%s4593_s2 + $0x1a0] sm:$0xff] }
 0x1a6   :  { %v811_v0 = vrot.slane %v810_v23, 2 }
 0x1a8   :  { %v812_v24 = vadd.f32 %v811_v0, %v810_v23  ;;  %v1269_v23 = vld [vmem:[%s4593_s2 + $0x1a8] sm:$0xff] }
 0x1aa   :  { %v813_v25 = vrot.slane %v812_v24, 1 }
 0x1ac   :  { %v814_v26 = vadd.f32 %v813_v25, %v812_v24  ;;  %v1223_v24 = vld [vmem:[%s4593_s2 + $0x38] sm:$0xff]  ;;  %v2935_v25 = vpack.c.bf16 %v1269_v23, %v1268_v12  ;;  %v804_v12 = vld [vmem:[%s4594_s3] sm:$0x1] }
 0x1ae   :  { %2542 = vmatmul.mubr.f32.vlgmr.msra.gmra.mrb[16].mxu1 %v814_v26  ;;  %v1252_v26 = vld [vmem:[%s4593_s2 + $0x120] sm:$0xff] }
 0x1af   :  { %2898 = vmatpush3.bf16.msra.mxu1 %v2897_v52  ;;  %v1274_v52 = vld [vmem:[%s4593_s2 + $0x1d0] sm:$0xff] }
 0x1b0   :  { %2900 = vmatprep.subr.bf16.mxu1 %v2899_v57  ;;  %v1275_v57 = vld [vmem:[%s4593_s2 + $0x1d8] sm:$0xff] }
 0x1b1   :  { %v2947_v62 = vpack.c.bf16 %v1275_v57, %v1274_v52 }
 0x1b3   :  { %2902 = vmatpush3.bf16.msra.mxu1 %v2901_v4  ;;  %v1258_v4 = vld [vmem:[%s4593_s2 + $0x150] sm:$0xff] }
 0x1b4   :  { %2904 = vmatprep.subr.bf16.mxu1 %v2903_v9  ;;  %v1277_v9 = vld [vmem:[%s4593_s2 + $0x1e8] sm:$0xff] }
 0x281   :  { %v897_v32 = vpop.f32.mrb[16].mxu1 }
 0x282   :  { %v904_v28 = vrot.slane %v897_v32, %v3865_v27  ;;  %v2543_v54 = vpop.f32.mrb[17].mxu1  ;;  %v1241_v32 = vld [vmem:[%s4593_s2 + $0xc8] sm:$0xff] }
 0x283   :  { %v2937_v54 = vpack.c.bf16 %v1253_v16, %v1252_v26 }
 0x284   :  { %v3868_v29 = vsub.f32 %v786_v17, %v904_v28  ;;  %v3870_v30 = vsub.f32 %v791_v14, %v904_v28  ;;  %v3872_v31 = vsub.f32 %v796_v20, %v904_v28  ;;  %v3874_v33 = vsub.f32 %v801_v63, %v904_v28  ;;  %v1266_v14 = vld [vmem:[%s4593_s2 + $0x190] sm:$0xff]  ;;  %v1239_v63 = vld [vmem:[%s4593_s2 + $0xb8] sm:$0xff] }
 0x285   :  { %v2931_v17 = vpack.c.bf16 %v1267_v53, %v1266_v14  ;;  %v2905_v20 = vpack.c.bf16 %v1221_v13, %v1220_v8  ;;  %v2907_v0 = vpack.c.bf16 %v1239_v63, %v1238_v18  ;;  %v1270_v28 = vld [vmem:[%s4593_s2 + $0x1b0] sm:$0xff]  ;;  %v1276_v8 = vld [vmem:[%s4593_s2 + $0x1e0] sm:$0xff]  ;;  %v1247_v13 = vld [vmem:[%s4593_s2 + $0xf8] sm:$0xff]  ;;  %v2949_v14 = vpack.c.bf16 %v1259_v5, %v1258_v4 }
 0x286   :  { %v909_v35 = vmul.f32 %v3868_v29, %v3868_v29  ;;  %v910_v2 = vmul.f32 %v3870_v30, %v3870_v30  ;;  %v911_v55 = vmul.f32 %v3872_v31, %v3872_v31  ;;  %v912_v37 = vmul.f32 %v3874_v33, %v3874_v33  ;;  %v1230_v63 = vld [vmem:[%s4593_s2 + $0x70] sm:$0xff]  ;;  %v1299_v5 = vld [vmem:[%s4593_s2 + $0x298] sm:$0xff] }
 0x287   :  { %2906 = vmatpush3.bf16.msra.mxu1 %v2905_v20  ;;  %v2921_v53 = vpack.c.bf16 %v1229_v7, %v1228_v59  ;;  %v2925_v19 = vpack.c.bf16 %v1231_v11, %v1230_v63  ;;  %v1280_v59 = vld [vmem:[%s4593_s2 + $0x200] sm:$0xff]  ;;  %v1298_v4 = vld [vmem:[%s4593_s2 + $0x290] sm:$0xff]  ;;  %v1313_v11 = vld [vmem:[%s4593_s2 + $0x308] sm:$0xff] }
 0x288   :  { %v913_v36 = vadd.f32 %v910_v2, %v909_v35  ;;  %v1271_v35 = vld [vmem:[%s4593_s2 + $0x1b8] sm:$0xff]  ;;  %v2909_v2 = vpack.c.bf16 %v1223_v24, %v1222_v60  ;;  %2908 = vmatprep.subr.bf16.mxu1 %v2907_v0  ;;  %v1312_v63 = vld [vmem:[%s4593_s2 + $0x300] sm:$0xff] }
 0x28a   :  { %v914_v38 = vadd.f32 %v913_v36, %v911_v55  ;;  %v1224_v55 = vld [vmem:[%s4593_s2 + $0x40] sm:$0xff]  ;;  %v2939_v36 = vpack.c.bf16 %v1271_v35, %v1270_v28 }
 0x28b   :  { %2910 = vmatpush3.bf16.msra.mxu1 %v2909_v2  ;;  %v1260_v28 = vld [vmem:[%s4593_s2 + $0x160] sm:$0xff] }
 0x28c   :  { %v915_v3 = vadd.f32 %v914_v38, %v912_v37  ;;  %v1254_v37 = vld [vmem:[%s4593_s2 + $0x130] sm:$0xff]  ;;  %v1255_v38 = vld [vmem:[%s4593_s2 + $0x138] sm:$0xff]  ;;  %v1296_v35 = vld [vmem:[%s4593_s2 + $0x280] sm:$0xff] }
 0x28e   :  { %v916_v56 = vrot.slane %v915_v3, 4 }
 0x290   :  { %v917_v39 = vadd.f32 %v916_v56, %v915_v3  ;;  %v2911_v3 = vpack.c.bf16 %v1241_v32, %v1240_v1  ;;  %v1225_v56 = vld [vmem:[%s4593_s2 + $0x48] sm:$0xff] }
 0x291   :  { %v2913_v45 = vpack.c.bf16 %v1225_v56, %v1224_v55 }
 0x292   :  { %v918_v22 = vrot.slane %v917_v39, 2  ;;  %2912 = vmatprep.subr.bf16.mxu1 %v2911_v3 }
 0x293   :  { %2914 = vmatpush3.bf16.msra.mxu1 %v2913_v45 }
 0x294   :  { %v919_v34 = vadd.f32 %v918_v22, %v917_v39  ;;  %v1272_v39 = vld [vmem:[%s4593_s2 + $0x1c0] sm:$0xff]  ;;  %v1273_v22 = vld [vmem:[%s4593_s2 + $0x1c8] sm:$0xff] }
 0x295   :  { %v2943_v47 = vpack.c.bf16 %v1273_v22, %v1272_v39 }
 0x296   :  { %v920_v42 = vrot.slane %v919_v34, 1 }
 0x298   :  { %v921_v43 = vadd.f32 %v920_v42, %v919_v34  ;;  %v1242_v34 = vld [vmem:[%s4593_s2 + $0xd0] sm:$0xff]  ;;  %v1243_v42 = vld [vmem:[%s4593_s2 + $0xd8] sm:$0xff] }
 0x299   :  { %v2915_v41 = vpack.c.bf16 %v1243_v42, %v1242_v34  ;;  %v1262_v34 = vld [vmem:[%s4593_s2 + $0x170] sm:$0xff]  ;;  %v1263_v42 = vld [vmem:[%s4593_s2 + $0x178] sm:$0xff] }
 0x29a   :  { %2577 = vmatmul.mubr.f32.vlgmr.msra.gmra.mrb[20].mxu0 %v921_v43  ;;  %v2941_v43 = vpack.c.bf16 %v1255_v38, %v1254_v37  ;;  %v1278_v37 = vld [vmem:[%s4593_s2 + $0x1f0] sm:$0xff]  ;;  %v1279_v38 = vld [vmem:[%s4593_s2 + $0x1f8] sm:$0xff]  ;;  %v2957_v45 = vpack.c.bf16 %v1263_v42, %v1262_v34  ;;  %v1332_v42 = vld [vmem:[%s4593_s2 + $0x3a0] sm:$0xff] }
 0x29b   :  { %2930 = vmatpush3.bf16.msra.mxu0 %v2929_v10  ;;  %2916 = vmatprep.subr.bf16.mxu1 %v2915_v41  ;;  %v1246_v10 = vld [vmem:[%s4593_s2 + $0xf0] sm:$0xff]  ;;  %v1287_v34 = vld [vmem:[%s4593_s2 + $0x238] sm:$0xff] }
 0x29c   :  { %2932 = vmatprep.subr.bf16.mxu0 %v2931_v17  ;;  %2918 = vmatpush3.bf16.msra.mxu1 %v2917_v49  ;;  %v2951_v17 = vpack.c.bf16 %v1277_v9, %v1276_v8  ;;  %v2923_v18 = vpack.c.bf16 %v1247_v13, %v1246_v10  ;;  %v2963_v9 = vpack.c.bf16 %v1299_v5, %v1298_v4  ;;  %v1282_v10 = vld [vmem:[%s4593_s2 + $0x210] sm:$0xff]  ;;  %v1283_v13 = vld [vmem:[%s4593_s2 + $0x218] sm:$0xff]  ;;  %v1288_v5 = vld [vmem:[%s4593_s2 + $0x240] sm:$0xff] }
 0x29d   :  { %2920 = vmatprep.subr.bf16.mxu1 %v2919_v6 }
 0x29f   :  { %2934 = vmatpush3.bf16.msra.mxu0 %v2933_v21 }
 0x2a0   :  { %2936 = vmatprep.subr.bf16.mxu0 %v2935_v25  ;;  %2922 = vmatpush3.bf16.msra.mxu1 %v2921_v53  ;;  %v2009_v25 = vld [vmem:[%s4595_s4] ss:$0 sm:$0xff] }
 0x2a1   :  { %2924 = vmatprep.subr.bf16.mxu1 %v2923_v18  ;;  %v1300_v53 = vld [vmem:[%s4593_s2 + $0x2a0] sm:$0xff]  ;;  %v2965_v18 = vpack.c.bf16 %v1283_v13, %v1282_v10  ;;  %v1307_v10 = vld [vmem:[%s4593_s2 + $0x2d8] sm:$0xff] }
 0x2a3   :  { %2938 = vmatpush3.bf16.msra.mxu0 %v2937_v54  ;;  %v1261_v54 = vld [vmem:[%s4593_s2 + $0x168] sm:$0xff] }
 0x2a4   :  { %2940 = vmatprep.subr.bf16.mxu0 %v2939_v36  ;;  %2926 = vmatpush3.bf16.msra.mxu1 %v2925_v19  ;;  %v2953_v2 = vpack.c.bf16 %v1261_v54, %v1260_v28  ;;  %v1284_v19 = vld [vmem:[%s4593_s2 + $0x220] sm:$0xff]  ;;  %v2993_v28 = vpack.c.bf16 %v1313_v11, %v1312_v63 }
 0x2a7   :  { %2942 = vmatpush3.bf16.msra.mxu0 %v2941_v43  ;;  %v2955_v43 = vpack.c.bf16 %v1279_v38, %v1278_v37 }
 0x2a8   :  { %2944 = vmatprep.subr.bf16.mxu0 %v2943_v47  ;;  %v1329_v47 = vld [vmem:[%s4593_s2 + $0x388] sm:$0xff] }
 0x2a9   :  { %v2991_v48 = vpack.c.bf16 %v1329_v47, %v1328_v46  ;;  %v1305_v46 = vld [vmem:[%s4593_s2 + $0x2c8] sm:$0xff] }
 0x2ab   :  { %2946 = vmatpush3.bf16.msra.mxu0 %v2945_v40 }
 0x2ac   :  { %2948 = vmatprep.subr.bf16.mxu0 %v2947_v62  ;;  %v1281_v62 = vld [vmem:[%s4593_s2 + $0x208] sm:$0xff] }
 0x2ad   :  { %v2961_v6 = vpack.c.bf16 %v1281_v62, %v1280_v59 }
 0x2af   :  { %2950 = vmatpush3.bf16.msra.mxu0 %v2949_v14 }
 0x2b0   :  { %2952 = vmatprep.subr.bf16.mxu0 %v2951_v17  ;;  %v1301_v17 = vld [vmem:[%s4593_s2 + $0x2a8] sm:$0xff] }
 0x2b3   :  { %2954 = vmatpush3.bf16.msra.mxu0 %v2953_v2 }
 0x2b4   :  { %2956 = vmatprep.subr.bf16.mxu0 %v2955_v43  ;;  %v1333_v43 = vld [vmem:[%s4593_s2 + $0x3a8] sm:$0xff] }
 0x2b7   :  { %2958 = vmatpush3.bf16.msra.mxu0 %v2957_v45  ;;  %v1304_v45 = vld [vmem:[%s4593_s2 + $0x2c0] sm:$0xff] }
 0x2b8   :  { %2992 = vmatprep.subr.bf16.mxu0 %v2991_v48  ;;  %v2975_v4 = vpack.c.bf16 %v1305_v46, %v1304_v45  ;;  %v1311_v45 = vld [vmem:[%s4593_s2 + $0x2f8] sm:$0xff] }
 0x36d   :  { %v988_v20 = vpop.f32.mrb[20].mxu0 }
 0x36e   :  { %v989_v21 = vadd.f32 1e-05, %v988_v20  ;;  %v2578_v60 = vpop.f32.mrb[21].mxu0 }
 0x36f   :  { %v1285_v60 = vld [vmem:[%s4593_s2 + $0x228] sm:$0xff] }
 0x370   :  { %3128 = vrsqrt.f32 %v989_v21  ;;  %v2969_v2 = vpack.c.bf16 %v1285_v60, %v1284_v19 }
 0x37a   :  { %v3129_v23 = vpop.eup %3128 }
 0x37b   :  { %v993_v0 = vmul.f32 %v3129_v23, %v804_v12  ;;  %v1330_v12 = vld [vmem:[%s4593_s2 + $0x390] sm:$0xff]  ;;  %v1331_v23 = vld [vmem:[%s4593_s2 + $0x398] sm:$0xff] }
 0x37d   :  { %v997_v24 = vrot.slane %v993_v0, %v3865_v27 }
 0x37f   :  { %v998_v26 = vmul.f32 %v997_v24, %v3868_v29  ;;  %v999_v16 = vmul.f32 %v997_v24, %v3870_v30  ;;  %v1000_v1 = vmul.f32 %v997_v24, %v3872_v31  ;;  %v1001_v32 = vmul.f32 %v997_v24, %v3874_v33  ;;  %v1297_v29 = vld [vmem:[%s4593_s2 + $0x288] sm:$0xff] }
 0x380   :  { %v2959_v36 = vpack.c.bf16 %v1297_v29, %v1296_v35  ;;  %v2995_v29 = vpack.c.bf16 %v1331_v23, %v1330_v12  ;;  %v1290_v12 = vld [vmem:[%s4593_s2 + $0x250] sm:$0xff]  ;;  %v1291_v23 = vld [vmem:[%s4593_s2 + $0x258] sm:$0xff] }
 0x381   :  { %v1008_v30 = vadd.f32 %v2009_v25, %v998_v26  ;;  %v1009_v31 = vadd.f32 %v2009_v25, %v999_v16  ;;  %v1010_v33 = vadd.f32 %v2009_v25, %v1000_v1  ;;  %v1011_v55 = vadd.f32 %v2009_v25, %v1001_v32  ;;  %v1302_v16 = vld [vmem:[%s4593_s2 + $0x2b0] sm:$0xff]  ;;  %v1303_v1 = vld [vmem:[%s4593_s2 + $0x2b8] sm:$0xff] }
 0x382   :  { %2960 = vmatprep.subr.bf16.mxu1 %v2959_v36  ;;  %v2967_v32 = vpack.c.bf16 %v1301_v17, %v1300_v53  ;;  %v2971_v38 = vpack.c.bf16 %v1303_v1, %v1302_v16  ;;  %v1318_v53 = vld [vmem:[%s4593_s2 + $0x330] sm:$0xff]  ;;  %v1319_v17 = vld [vmem:[%s4593_s2 + $0x338] sm:$0xff]  ;;  %v1336_v16 = vld [vmem:[%s4593_s2 + $0x3c0] sm:$0xff] }
 0x383   :  { %v4087_v3 = vmax.f32 %v1008_v30, 0.0  ;;  %v4089_v56 = vmax.f32 %v1009_v31, 0.0  ;;  %v4091_v39 = vmax.f32 %v1010_v33, 0.0  ;;  %v4093_v22 = vmax.f32 %v1011_v55, 0.0  ;;  %v1314_v30 = vld [vmem:[%s4593_s2 + $0x310] sm:$0xff]  ;;  %v1315_v31 = vld [vmem:[%s4593_s2 + $0x318] sm:$0xff] }
 0x384   :  { %v1286_v33 = vld [vmem:[%s4593_s2 + $0x230] sm:$0xff]  ;;  %v2997_v47 = vpack.c.bf16 %v1315_v31, %v1314_v30 }
 0x385   :  { %1020 = vst [vmem:[#allocation2 - $0x1] sm:$0x2] %v4087_v3  ;;  %1021 = vst [vmem:[#allocation2 + $0x17] sm:$0x2] %v4091_v39 }
 0x386   :  { %1022 = vst [vmem:[#allocation2 + $0xb] sm:$0x40] %v4089_v56  ;;  %1023 = vst [vmem:[#allocation2 + $0x23] sm:$0x40] %v4093_v22 }
 0x387   :  { %1016 = vst [vmem:[#allocation2 + $0x1] sm:$0xff] %v4087_v3  ;;  %1017 = vst [vmem:[#allocation2 + $0x9] sm:$0xff] %v4089_v56 }
 0x388   :  { %1018 = vst [vmem:[#allocation2 + $0x19] sm:$0xff] %v4091_v39  ;;  %1019 = vst [vmem:[#allocation2 + $0x21] sm:$0xff] %v4093_v22 }
 0x38e   :  { %v1024_v50 = vld [vmem:[#allocation2] sm:$0xff]  ;;  %v1025_v41 = vld [vmem:[#allocation2 + $0x8] sm:$0xff] }
 0x38f   :  { %1044 = vrot.lane.b32.xlu1 %v1024_v50, %s3133_s24  ;;  %1032 = vrot.lane.b32.xlu0 %v1024_v50, %s3132_s9  ;;  %v3123_v51 = vpack.i.bf16 %v4087_v3, %v1025_v41  ;;  %v4120_v52 = vld [vmem:[#allocation2 + $0x18] sm:$0xff]  ;;  %v4126_v57 = vld [vmem:[#allocation2 + $0x20] sm:$0xff]  ;;  %v4150_v61 = vld [vmem:[#allocation2 + $0xa] sm:$0xff] }
 0x390   :  { %1424 = vmatprep.mubr.f32.mxu1 %v1024_v50  ;;  %v4144_v58 = vld [vmem:[#allocation2 + $0x2] sm:$0xff]  ;;  %v4156_v40 = vld [vmem:[#allocation2 + $0x1a] sm:$0xff]  ;;  %v2973_v50 = vpack.c.bf16 %v1287_v34, %v1286_v33 }
 0x391   :  { %v4162_v49 = vld [vmem:[#allocation2 + $0x22] sm:$0xff] }
 0x393   :  { %3124 = vrot.lane.b32.xlu1 %v3123_v51, %s3133_s24  ;;  %3119 = vrot.lane.b32.xlu0 %v3123_v51, %s3132_s9  ;;  %v1316_v51 = vld [vmem:[%s4593_s2 + $0x320] sm:$0xff] }
 0x397   :  { %1048 = vrot.lane.b32.xlu1 %v4120_v52, %s3133_s24  ;;  %1036 = vrot.lane.b32.xlu0 %v4120_v52, %s3132_s9 }
 0x39b   :  { %1050 = vrot.lane.b32.xlu1 %v4126_v57, %s3133_s24  ;;  %1038 = vrot.lane.b32.xlu0 %v4126_v57, %s3132_s9 }
 0x39f   :  { %1098 = vrot.lane.b32.xlu1 %v4089_v56, %s3133_s24  ;;  %1086 = vrot.lane.b32.xlu0 %v4089_v56, %s3132_s9 }
 0x3a3   :  { %1100 = vrot.lane.b32.xlu1 %v4091_v39, %s3133_s24  ;;  %1088 = vrot.lane.b32.xlu0 %v4091_v39, %s3132_s9 }
 0x3a7   :  { %1102 = vrot.lane.b32.xlu1 %v4093_v22, %s3133_s24  ;;  %1090 = vrot.lane.b32.xlu0 %v4093_v22, %s3132_s9 }
 0x3ab   :  { %1148 = vrot.lane.b32.xlu1 %v4144_v58, %s3133_s24  ;;  %1136 = vrot.lane.b32.xlu0 %v4144_v58, %s3132_s9 }
 0x3af   :  { %1150 = vrot.lane.b32.xlu1 %v4150_v61, %s3133_s24  ;;  %1138 = vrot.lane.b32.xlu0 %v4150_v61, %s3132_s9 }
 0x3b3   :  { %1152 = vrot.lane.b32.xlu1 %v4156_v40, %s3133_s24  ;;  %1140 = vrot.lane.b32.xlu0 %v4156_v40, %s3132_s9 }
 0x3b7   :  { %1154 = vrot.lane.b32.xlu1 %v4162_v49, %s3133_s24  ;;  %1142 = vrot.lane.b32.xlu0 %v4162_v49, %s3132_s9 }
 0x401   :  { %v1045_v7 = vpop.permute.xlu1 %1044  ;;  %v1033_v8 = vpop.permute.xlu0 %1032 }
 0x402   :  { %v1056_v14 = vsel %vm73_vm0, %v1033_v8, %v1045_v7  ;;  %v1060_v55 = vsel %vm78_vm1, %v1033_v8, %v1045_v7  ;;  %v1334_v7 = vld [vmem:[%s4593_s2 + $0x3b0] sm:$0xff]  ;;  %v1335_v8 = vld [vmem:[%s4593_s2 + $0x3b8] sm:$0xff] }
 0x403   :  { %1425 = vmatmul.mubr.f32.vlgmr.msra.gmra.mrb[18].mxu1 %v1056_v14  ;;  %v3003_v19 = vpack.c.bf16 %v1335_v8, %v1334_v7  ;;  %v1344_v7 = vld [vmem:[%s4593_s2 + $0x400] sm:$0xff]  ;;  %v1345_v8 = vld [vmem:[%s4593_s2 + $0x408] sm:$0xff] }
 0x404   :  { %2962 = vmatpush3.bf16.msra.mxu1 %v2961_v6  ;;  %1429 = vmatprep.mubr.f32.mxu1 %v1025_v41  ;;  %v2999_v41 = vpack.c.bf16 %v1333_v43, %v1332_v42  ;;  %v1289_v6 = vld [vmem:[%s4593_s2 + $0x248] sm:$0xff]  ;;  %v1310_v43 = vld [vmem:[%s4593_s2 + $0x2f0] sm:$0xff] }
 0x405   :  { %v4202_v20 = vpop.permute.xlu1 %3124  ;;  %v4204_v21 = vpop.permute.xlu0 %3119  ;;  %2964 = vmatprep.subr.bf16.mxu1 %v2963_v9  ;;  %v1306_v9 = vld [vmem:[%s4593_s2 + $0x2d0] sm:$0xff] }
 0x406   :  { %v3127_v0 = vunpack.i.h.bf16 %v4202_v20  ;;  %v3126_v24 = vunpack.i.l.bf16 %v4202_v20  ;;  %v3122_v25 = vunpack.i.h.bf16 %v4204_v21  ;;  %v3121_v26 = vunpack.i.l.bf16 %v4204_v21 }
 0x407   :  { %v2979_v60 = vpack.c.bf16 %v1307_v10, %v1306_v9 }
 0x408   :  { %2966 = vmatpush3.bf16.msra.mxu1 %v2965_v18  ;;  %v1057_v54 = vsel %vm73_vm0, %v3121_v26, %v3126_v24  ;;  %v1108_v35 = vsel %vm73_vm0, %v3122_v25, %v3127_v0  ;;  %v1112_v11 = vsel %vm78_vm1, %v3122_v25, %v3127_v0  ;;  %v1337_v0 = vld [vmem:[%s4593_s2 + $0x3c8] sm:$0xff]  ;;  %v1308_v25 = vld [vmem:[%s4593_s2 + $0x2e0] sm:$0xff] }
 0x409   :  { %v4243_v36 = vpop.permute.xlu1 %1048  ;;  %v4245_v37 = vpop.permute.xlu0 %1036  ;;  %1430 = vmatmul.mubr.f32.gmra.mrb[20].mxu1 %v1057_v54  ;;  %1509 = vmatprep.mubr.f32.mxu0 %v1108_v35  ;;  %v3005_v54 = vpack.c.bf16 %v1319_v17, %v1318_v53  ;;  %v2981_v35 = vpack.c.bf16 %v1291_v23, %v1290_v12  ;;  %v3007_v20 = vpack.c.bf16 %v1337_v0, %v1336_v16  ;;  %v1325_v53 = vld [vmem:[%s4593_s2 + $0x368] sm:$0xff]  ;;  %v1326_v23 = vld [vmem:[%s4593_s2 + $0x370] sm:$0xff]  ;;  %v1327_v16 = vld [vmem:[%s4593_s2 + $0x378] sm:$0xff] }
 0x40a   :  { %1434 = vmatprep.mubr.f32.mxu1 %v4120_v52  ;;  %1510 = vmatmul.mubr.f32.vlgmr.msra.gmra.mrb[22].mxu0 %v1060_v55  ;;  %v1058_v48 = vsel %vm73_vm0, %v4245_v37, %v4243_v36  ;;  %v1317_v52 = vld [vmem:[%s4593_s2 + $0x328] sm:$0xff]  ;;  %v1338_v55 = vld [vmem:[%s4593_s2 + $0x3d0] sm:$0xff]  ;;  %v1062_v34 = vsel %vm78_vm1, %v4245_v37, %v4243_v36  ;;  %v1323_v36 = vld [vmem:[%s4593_s2 + $0x358] sm:$0xff]  ;;  %v3023_v17 = vpack.c.bf16 %v1345_v8, %v1344_v7 }
 0x40b   :  { %2968 = vmatprep.subr.bf16.mxu1 %v2967_v32  ;;  %2994 = vmatpush3.bf16.msra.mxu0 %v2993_v28  ;;  %v3001_v13 = vpack.c.bf16 %v1317_v52, %v1316_v51  ;;  %v1309_v32 = vld [vmem:[%s4593_s2 + $0x2e8] sm:$0xff]  ;;  %v1061_v28 = vsel %vm78_vm1, %v3121_v26, %v3126_v24  ;;  %v1292_v24 = vld [vmem:[%s4593_s2 + $0x260] sm:$0xff]  ;;  %v1294_v37 = vld [vmem:[%s4593_s2 + $0x270] sm:$0xff] }
 0x40c   :  { %2970 = vmatpush3.bf16.msra.mxu1 %v2969_v2  ;;  %2996 = vmatprep.subr.bf16.mxu0 %v2995_v29  ;;  %v1320_v2 = vld [vmem:[%s4593_s2 + $0x340] sm:$0xff]  ;;  %v1321_v29 = vld [vmem:[%s4593_s2 + $0x348] sm:$0xff]  ;;  %v2983_v21 = vpack.c.bf16 %v1309_v32, %v1308_v25  ;;  %v1295_v51 = vld [vmem:[%s4593_s2 + $0x278] sm:$0xff] }
 0x40d   :  { %v4272_v59 = vpop.permute.xlu1 %1050  ;;  %v4274_v62 = vpop.permute.xlu0 %1038  ;;  %1435 = vmatmul.mubr.f32.gmra.mrb[22].mxu1 %v1058_v48  ;;  %2972 = vmatprep.subr.bf16.mxu1 %v2971_v38  ;;  %v1293_v26 = vld [vmem:[%s4593_s2 + $0x268] sm:$0xff]  ;;  %v1339_v38 = vld [vmem:[%s4593_s2 + $0x3d8] sm:$0xff]  ;;  %v3009_v42 = vpack.c.bf16 %v1321_v29, %v1320_v2  ;;  %v1340_v52 = vld [vmem:[%s4593_s2 + $0x3e0] sm:$0xff] }
 0x40e   :  { %1439 = vmatprep.mubr.f32.mxu1 %v4126_v57  ;;  %v1059_v14 = vsel %vm73_vm0, %v4274_v62, %v4272_v59  ;;  %v2977_v57 = vpack.c.bf16 %v1289_v6, %v1288_v5  ;;  %v2985_v46 = vpack.c.bf16 %v1293_v26, %v1292_v24  ;;  %v2987_v6 = vpack.c.bf16 %v1311_v45, %v1310_v43  ;;  %v1348_v25 = vld [vmem:[%s4593_s2 + $0x420] sm:$0xff]  ;;  %v1349_v32 = vld [vmem:[%s4593_s2 + $0x428] sm:$0xff] }
 0x40f   :  { %2998 = vmatpush3.bf16.msra.mxu0 %v2997_v47  ;;  %v1322_v47 = vld [vmem:[%s4593_s2 + $0x350] sm:$0xff]  ;;  %v1063_v9 = vsel %vm78_vm1, %v4274_v62, %v4272_v59  ;;  %v1343_v62 = vld [vmem:[%s4593_s2 + $0x3f8] sm:$0xff]  ;;  %v1352_v24 = vld [vmem:[%s4593_s2 + $0x440] sm:$0xff] }
 0x410   :  { %2974 = vmatpush3.bf16.msra.mxu1 %v2973_v50  ;;  %3000 = vmatprep.subr.bf16.mxu0 %v2999_v41  ;;  %v3011_v41 = vpack.c.bf16 %v1339_v38, %v1338_v55  ;;  %v3013_v10 = vpack.c.bf16 %v1323_v36, %v1322_v47  ;;  %v1342_v59 = vld [vmem:[%s4593_s2 + $0x3f0] sm:$0xff]  ;;  %v1801_v8 = vld [vmem:[%s4592_s7 + $0x28] sm:$0xff] }
 0x411   :  { %v4304_v18 = vpop.permute.xlu1 %1098  ;;  %v4306_v63 = vpop.permute.xlu0 %1086  ;;  %1440 = vmatmul.mubr.f32.gmra.mrb[24].mxu1 %v1059_v14  ;;  %2976 = vmatprep.subr.bf16.mxu1 %v2975_v4  ;;  %v1341_v4 = vld [vmem:[%s4593_s2 + $0x3e8] sm:$0xff]  ;;  %v1354_v38 = vld [vmem:[%s4593_s2 + $0x450] sm:$0xff] }
 0x412   :  { %1594 = vmatprep.mubr.f32.mxu1 %v1112_v11  ;;  %v1109_v1 = vsel %vm73_vm0, %v4306_v63, %v4304_v18  ;;  %v3015_v14 = vpack.c.bf16 %v1341_v4, %v1340_v52  ;;  %v1346_v11 = vld [vmem:[%s4593_s2 + $0x410] sm:$0xff]  ;;  %v1797_v52 = vld [vmem:[%s4592_s7 + $0x8] sm:$0xff] }
 0x413   :  { %3002 = vmatpush3.bf16.msra.mxu0 %v3001_v13  ;;  %1514 = vmatprep.mubr.f32.mxu0 %v1109_v1  ;;  %v2989_v13 = vpack.c.bf16 %v1295_v51, %v1294_v37  ;;  %v3019_v1 = vpack.c.bf16 %v1343_v62, %v1342_v59  ;;  %v1358_v36 = vld [vmem:[%s4593_s2 + $0x470] sm:$0xff]  ;;  %v1359_v37 = vld [vmem:[%s4593_s2 + $0x478] sm:$0xff]  ;;  %v1796_v51 = vld [vmem:[%s4592_s7] sm:$0xff] }
 0x414   :  { %2978 = vmatpush3.bf16.msra.mxu1 %v2977_v57  ;;  %1515 = vmatmul.mubr.f32.gmra.mrb[24].mxu0 %v1061_v28  ;;  %v1324_v57 = vld [vmem:[%s4593_s2 + $0x360] sm:$0xff]  ;;  %v1113_v28 = vsel %vm78_vm1, %v4306_v63, %v4304_v18  ;;  %v1798_v4 = vld [vmem:[%s4592_s7 + $0x10] sm:$0xff]  ;;  %v1807_v62 = vld [vmem:[%s4592_s7 + $0x58] sm:$0xff] }
 0x415   :  { %v4343_v30 = vpop.permute.xlu1 %1100  ;;  %v4345_v31 = vpop.permute.xlu0 %1088  ;;  %3004 = vmatprep.subr.bf16.mxu0 %v3003_v19  ;;  %2980 = vmatprep.subr.bf16.mxu1 %v2979_v60  ;;  %v1347_v19 = vld [vmem:[%s4593_s2 + $0x418] sm:$0xff]  ;;  %v1806_v59 = vld [vmem:[%s4592_s7 + $0x50] sm:$0xff] }
 0x416   :  { %v1110_v33 = vsel %vm73_vm0, %v4345_v31, %v4343_v30  ;;  %v3027_v0 = vpack.c.bf16 %v1347_v19, %v1346_v11  ;;  %v1114_v18 = vsel %vm78_vm1, %v4345_v31, %v4343_v30  ;;  %v3071_v11 = vpack.c.bf16 %v1807_v62, %v1806_v59  ;;  %v1808_v19 = vld [vmem:[%s4592_s7 + $0x60] sm:$0xff] }
 0x417   :  { %3006 = vmatpush3.bf16.msra.mxu0 %v3005_v54  ;;  %1519 = vmatprep.mubr.f32.mxu0 %v1110_v33  ;;  %v3021_v54 = vpack.c.bf16 %v1327_v16, %v1326_v23  ;;  %v1811_v23 = vld [vmem:[%s4592_s7 + $0x78] sm:$0xff] }
 0x418   :  { %2982 = vmatpush3.bf16.msra.mxu1 %v2981_v35  ;;  %1520 = vmatmul.mubr.f32.gmra.mrb[26].mxu0 %v1062_v34  ;;  %v3031_v35 = vpack.c.bf16 %v1349_v32, %v1348_v25 }
 0x419   :  { %v4380_v48 = vpop.permute.xlu1 %1102  ;;  %v4382_v50 = vpop.permute.xlu0 %1090  ;;  %3008 = vmatprep.subr.bf16.mxu0 %v3007_v20  ;;  %2984 = vmatprep.subr.bf16.mxu1 %v2983_v21  ;;  %v1350_v20 = vld [vmem:[%s4593_s2 + $0x430] sm:$0xff] }
 0x41a   :  { %v1111_v5 = vsel %vm73_vm0, %v4382_v50, %v4380_v48  ;;  %v1115_v30 = vsel %vm78_vm1, %v4382_v50, %v4380_v48 }
 0x41b   :  { %3010 = vmatpush3.bf16.msra.mxu0 %v3009_v42  ;;  %1524 = vmatprep.mubr.f32.mxu0 %v1111_v5  ;;  %v3056_v5 = vpack.c.bf16 %v1797_v52, %v1796_v51 }
 0x41c   :  { %2986 = vmatpush3.bf16.msra.mxu1 %v2985_v46  ;;  %1525 = vmatmul.mubr.f32.gmra.mrb[28].mxu0 %v1063_v9  ;;  %v1356_v46 = vld [vmem:[%s4593_s2 + $0x460] sm:$0xff] }
 0x41d   :  { %3012 = vmatprep.subr.bf16.mxu0 %v3011_v41  ;;  %1679 = vmatprep.mubr.f32.mxu0 %v4144_v58  ;;  %v3017_v58 = vpack.c.bf16 %v1325_v53, %v1324_v57  ;;  %v1149_v60 = vpop.permute.xlu1 %1148  ;;  %v1137_v12 = vpop.permute.xlu0 %1136  ;;  %v1804_v57 = vld [vmem:[%s4592_s7 + $0x40] sm:$0xff]  ;;  %v1805_v53 = vld [vmem:[%s4592_s7 + $0x48] sm:$0xff] }
 0x41e   :  { %2988 = vmatprep.subr.bf16.mxu1 %v2987_v6  ;;  %v1160_v63 = vsel %vm73_vm0, %v1137_v12, %v1149_v60  ;;  %v1799_v6 = vld [vmem:[%s4592_s7 + $0x18] sm:$0xff] }
 0x41f   :  { %3014 = vmatpush3.bf16.msra.mxu0 %v3013_v10  ;;  %v3059_v7 = vpack.c.bf16 %v1799_v6, %v1798_v4  ;;  %v1802_v10 = vld [vmem:[%s4592_s7 + $0x30] sm:$0xff] }
 0x420   :  { %2990 = vmatpush3.bf16.msra.mxu1 %v2989_v13  ;;  %3016 = vmatprep.subr.bf16.mxu0 %v3015_v14  ;;  %v1803_v13 = vld [vmem:[%s4592_s7 + $0x38] sm:$0xff] }
 0x421   :  { %3024 = vmatprep.subr.bf16.mxu1 %v3023_v17  ;;  %v1151_v2 = vpop.permute.xlu1 %1150  ;;  %v1139_v29 = vpop.permute.xlu0 %1138  ;;  %v3065_v14 = vpack.c.bf16 %v1803_v13, %v1802_v10 }
 0x422   :  { %v1161_v33 = vsel %vm73_vm0, %v1139_v29, %v1151_v2  ;;  %v1165_v48 = vsel %vm78_vm1, %v1139_v29, %v1151_v2 }
 0x423   :  { %1595 = vmatmul.mubr.f32.vlgmr.msra.gmra.mrb[26].mxu1 %v4087_v3  ;;  %3018 = vmatpush3.bf16.msra.mxu0 %v3017_v58  ;;  %v1351_v3 = vld [vmem:[%s4593_s2 + $0x438] sm:$0xff]  ;;  %v1809_v58 = vld [vmem:[%s4592_s7 + $0x68] sm:$0xff] }
 0x424   :  { %1599 = vmatprep.mubr.f32.mxu1 %v1113_v28  ;;  %3026 = vmatpush3.bf16.msra.mxu1 %v3023_v17  ;;  %v3035_v21 = vpack.c.bf16 %v1351_v3, %v1350_v20  ;;  %v3068_v17 = vpack.c.bf16 %v1805_v53, %v1804_v57 }
 0x425   :  { %3020 = vmatprep.subr.bf16.mxu0 %v3019_v1  ;;  %3028 = vmatprep.subr.bf16.mxu1 %v3027_v0  ;;  %v1153_v31 = vpop.permute.xlu1 %1152  ;;  %v1141_v26 = vpop.permute.xlu0 %1140 }
 0x426   :  { %v1162_v34 = vsel %vm73_vm0, %v1141_v26, %v1153_v31  ;;  %v1166_v50 = vsel %vm78_vm1, %v1141_v26, %v1153_v31 }
 0x427   :  { %1600 = vmatmul.mubr.f32.gmra.mrb[28].mxu1 %v4089_v56  ;;  %3022 = vmatpush3.bf16.msra.mxu0 %v3021_v54  ;;  %v1353_v56 = vld [vmem:[%s4593_s2 + $0x448] sm:$0xff] }
 0x428   :  { %1604 = vmatprep.mubr.f32.mxu1 %v1114_v18  ;;  %3030 = vmatpush3.bf16.msra.mxu1 %v3027_v0  ;;  %v3039_v55 = vpack.c.bf16 %v1353_v56, %v1352_v24 }
 0x429   :  { %3032 = vmatprep.subr.bf16.mxu1 %v3031_v35  ;;  %3055 = vmatprep.subr.bf16.mxu0 %v3134_v44  ;;  %v1155_v43 = vpop.permute.xlu1 %1154  ;;  %v1143_v45 = vpop.permute.xlu0 %1142 }
 0x42a   :  { %1680 = vmatmul.mubr.f32.vlgmr.msra.gmra.mrb[30].mxu0 %v1160_v63  ;;  %v1167_v41 = vsel %vm78_vm1, %v1143_v45, %v1155_v43 }
 0x42b   :  { %1605 = vmatmul.mubr.f32.gmra.mrb[30].mxu1 %v4091_v39  ;;  %1684 = vmatprep.mubr.f32.mxu0 %v4150_v61  ;;  %v1355_v39 = vld [vmem:[%s4593_s2 + $0x458] sm:$0xff]  ;;  %v1164_v61 = vsel %vm78_vm1, %v1137_v12, %v1149_v60  ;;  %v3074_v60 = vpack.c.bf16 %v1809_v58, %v1808_v19  ;;  %v1810_v12 = vld [vmem:[%s4592_s7 + $0x70] sm:$0xff] }
 0x42c   :  { %1609 = vmatprep.mubr.f32.mxu1 %v1115_v30  ;;  %3034 = vmatpush3.bf16.msra.mxu1 %v3031_v35  ;;  %v3043_v42 = vpack.c.bf16 %v1355_v39, %v1354_v38  ;;  %v3077_v16 = vpack.c.bf16 %v1811_v23, %v1810_v12 }
 0x42d   :  { %3036 = vmatprep.subr.bf16.mxu1 %v3035_v21  ;;  %3057 = vmatpush3.bf16.msra.mxu0 %v3056_v5 }
 0x42e   :  { %1685 = vmatmul.mubr.f32.gmra.mrb[32].mxu0 %v1161_v33  ;;  %3058 = vmatprep.subr.bf16.mxu0 %v3134_v44 }
 0x42f   :  { %1610 = vmatmul.mubr.f32.gmra.mrb[32].mxu1 %v4093_v22  ;;  %1689 = vmatprep.mubr.f32.mxu0 %v4156_v40  ;;  %v1357_v22 = vld [vmem:[%s4593_s2 + $0x468] sm:$0xff]  ;;  %v1163_v40 = vsel %vm73_vm0, %v1143_v45, %v1155_v43 }
 0x430   :  { %3038 = vmatpush3.bf16.msra.mxu1 %v3035_v21  ;;  %2611 = vmatprep.mubr.f32.mxu1 %v1164_v61  ;;  %v3047_v47 = vpack.c.bf16 %v1357_v22, %v1356_v46 }
 0x431   :  { %3040 = vmatprep.subr.bf16.mxu1 %v3039_v55  ;;  %3060 = vmatpush3.bf16.msra.mxu0 %v3059_v7 }
 0x432   :  { %1690 = vmatmul.mubr.f32.gmra.mrb[34].mxu0 %v1162_v34  ;;  %3061 = vmatprep.subr.bf16.mxu0 %v3134_v44 }
 0x433   :  { %1694 = vmatprep.mubr.f32.mxu0 %v4162_v49  ;;  %v3051_v49 = vpack.c.bf16 %v1359_v37, %v1358_v36 }
 0x434   :  { %3042 = vmatpush3.bf16.msra.mxu1 %v3039_v55 }
 0x435   :  { %3044 = vmatprep.subr.bf16.mxu1 %v3043_v42 }
 0x436   :  { %1695 = vmatmul.mubr.f32.gmra.mrb[36].mxu0 %v1163_v40 }
 0x437   :  { %2649 = vmatprep.mubr.msk.f32.mxu0 %vm3135_vm2, %v3136_v15 }
 0x438   :  { %3046 = vmatpush3.bf16.msra.mxu1 %v3043_v42 }
 0x439   :  { %3048 = vmatprep.subr.bf16.mxu1 %v3047_v47 }
 0x43c   :  { %3050 = vmatpush3.bf16.msra.mxu1 %v3047_v47 }
 0x43d   :  { %3052 = vmatprep.subr.bf16.mxu1 %v3051_v49 }
 0x440   :  { %3054 = vmatpush3.bf16.msra.mxu1 %v3051_v49 }
 0x441   :  { %3079 = vmatprep.subr.bf16.mxu1 %v3134_v44 }
 0x443   :  { %2612 = vmatmul.mubr.f32.vlgmr.msra.gmra.mrb[34].mxu1 %v1165_v48 }
 0x444   :  { %2614 = vmatprep.mubr.f32.mxu1 %v1166_v50  ;;  %3081 = vmatpush3.bf16.msra.mxu1 %v3056_v5 }
 0x445   :  { %3082 = vmatprep.subr.bf16.mxu1 %v3134_v44 }
 0x447   :  { %2615 = vmatmul.mubr.f32.gmra.mrb[36].mxu1 %v1167_v41 }
 0x448   :  { %2684 = vmatprep.mubr.msk.f32.mxu1 %vm3135_vm2, %v3136_v15  ;;  %3084 = vmatpush3.bf16.msra.mxu1 %v3059_v7  ;;  %v1800_v15 = vld [vmem:[%s4592_s7 + $0x20] sm:$0xff] }
 0x449   :  { %3085 = vmatprep.subr.bf16.mxu1 %v3134_v44  ;;  %v3062_v9 = vpack.c.bf16 %v1801_v8, %v1800_v15 }
 0x44b   :  { %3063 = vmatpush3.bf16.msra.mxu0 %v3062_v9 }
 0x44c   :  { %3087 = vmatpush3.bf16.msra.mxu1 %v3062_v9  ;;  %3064 = vmatprep.subr.bf16.mxu0 %v3134_v44 }
 0x44d   :  { %3088 = vmatprep.subr.bf16.mxu1 %v3134_v44 }
 0x44f   :  { %3066 = vmatpush3.bf16.msra.mxu0 %v3065_v14 }
 0x450   :  { %3090 = vmatpush3.bf16.msra.mxu1 %v3065_v14  ;;  %3067 = vmatprep.subr.bf16.mxu0 %v3134_v44 }
 0x451   :  { %3091 = vmatprep.subr.bf16.mxu1 %v3134_v44 }
 0x453   :  { %3069 = vmatpush3.bf16.msra.mxu0 %v3068_v17 }
 0x454   :  { %3093 = vmatpush3.bf16.msra.mxu1 %v3068_v17  ;;  %3070 = vmatprep.subr.bf16.mxu0 %v3134_v44 }
 0x455   :  { %3094 = vmatprep.subr.bf16.mxu1 %v3134_v44 }
 0x457   :  { %3072 = vmatpush3.bf16.msra.mxu0 %v3071_v11 }
 0x458   :  { %3096 = vmatpush3.bf16.msra.mxu1 %v3071_v11  ;;  %3073 = vmatprep.subr.bf16.mxu0 %v3134_v44 }
 0x459   :  { %3097 = vmatprep.subr.bf16.mxu1 %v3134_v44 }
 0x45b   :  { %3075 = vmatpush3.bf16.msra.mxu0 %v3074_v60 }
 0x45c   :  { %3099 = vmatpush3.bf16.msra.mxu1 %v3074_v60  ;;  %3076 = vmatprep.subr.bf16.mxu0 %v3134_v44 }
 0x45d   :  { %3100 = vmatprep.subr.bf16.mxu1 %v3134_v44 }
 0x45f   :  { %3078 = vmatpush3.bf16.msra.mxu0 %v3077_v16 }
 0x460   :  { %3102 = vmatpush3.bf16.msra.mxu1 %v3077_v16 }
 0x4d6   :  { %v2273_v1 = vpop.f32.mrb[18].mxu1 }
 0x4d7   :  { %v2274_v0 = vpop.f32.mrb[19].mxu1 }
 0x4d8   :  { %v2275_v25 = vadd.f32 %v2274_v0, %v2273_v1 }
 0x4dc   :  { %v2276_v32 = vpop.f32.mrb[20].mxu1 }
 0x4dd   :  { %v2277_v28 = vpop.f32.mrb[21].mxu1  ;;  %v2317_v54 = vpop.f32.mrb[22].mxu0 }
 0x4de   :  { %v2278_v35 = vadd.f32 %v2277_v28, %v2276_v32  ;;  %v2318_v2 = vpop.f32.mrb[23].mxu0 }
 0x4df   :  { %v2319_v29 = vadd.f32 %v2318_v2, %v2317_v54 }
 0x4e0   :  { %v2279_v20 = vpop.f32.mrb[22].mxu1 }
 0x4e1   :  { %v1512_v3 = vadd.f32 %v2319_v29, %v2275_v25  ;;  %v2280_v18 = vpop.f32.mrb[23].mxu1 }
 0x4e2   :  { %v2281_v63 = vadd.f32 %v2280_v18, %v2279_v20 }
 0x4e4   :  { %v2282_v21 = vpop.f32.mrb[24].mxu1 }
 0x4e5   :  { %v2283_v24 = vpop.f32.mrb[25].mxu1 }
 0x4e6   :  { %v2284_v56 = vadd.f32 %v2283_v24, %v2282_v21 }
 0x4e7   :  { %v2320_v44 = vpop.f32.mrb[24].mxu0 }
 0x4e8   :  { %v2321_v30 = vpop.f32.mrb[25].mxu0 }
 0x4e9   :  { %v2322_v31 = vadd.f32 %v2321_v30, %v2320_v44 }
 0x4eb   :  { %v1517_v26 = vadd.f32 %v2322_v31, %v2278_v35  ;;  %v2323_v33 = vpop.f32.mrb[26].mxu0 }
 0x4ec   :  { %v2324_v55 = vpop.f32.mrb[27].mxu0 }
 0x4ed   :  { %v2325_v38 = vadd.f32 %v2324_v55, %v2323_v33 }
 0x4ef   :  { %v1522_v39 = vadd.f32 %v2325_v38, %v2281_v63  ;;  %v2326_v61 = vpop.f32.mrb[28].mxu0 }
 0x4f0   :  { %v2327_v34 = vpop.f32.mrb[29].mxu0 }
 0x4f1   :  { %v2328_v42 = vadd.f32 %v2327_v34, %v2326_v61 }
 0x4f3   :  { %v1527_v43 = vadd.f32 %v2328_v42, %v2284_v56 }
 0x4f6   :  { %v2361_v45 = vpop.f32.mrb[26].mxu1 }
 0x4f7   :  { %v2362_v46 = vpop.f32.mrb[27].mxu1 }
 0x4f8   :  { %v2363_v22 = vadd.f32 %v2362_v46, %v2361_v45 }
 0x4fa   :  { %v1597_v40 = vadd.f32 %v2363_v22, %v1512_v3  ;;  %v2364_v47 = vpop.f32.mrb[28].mxu1 }
 0x4fb   :  { %v2365_v36 = vpop.f32.mrb[29].mxu1 }
 0x4fc   :  { %v2366_v37 = vadd.f32 %v2365_v36, %v2364_v47 }
 0x4fd   :  { %v2405_v49 = vpop.f32.mrb[30].mxu0 }
 0x4fe   :  { %v1602_v48 = vadd.f32 %v2366_v37, %v1517_v26  ;;  %v2367_v50 = vpop.f32.mrb[30].mxu1  ;;  %v2406_v41 = vpop.f32.mrb[31].mxu0 }
 0x4ff   :  { %v2407_v51 = vadd.f32 %v2406_v41, %v2405_v49  ;;  %v2368_v52 = vpop.f32.mrb[31].mxu1 }
 0x500   :  { %v2369_v4 = vadd.f32 %v2368_v52, %v2367_v50  ;;  %v1785_v50 = vld [vmem:[%s4596_s5] sm:$0x1] }
 0x501   :  { %v2408_v5 = vpop.f32.mrb[32].mxu0  ;;  %v1682_v6 = vadd.f32 %v2407_v51, %v1597_v40 }
 0x502   :  { %v1607_v7 = vadd.f32 %v2369_v4, %v1522_v39  ;;  %v2370_v15 = vpop.f32.mrb[32].mxu1  ;;  %v2409_v8 = vpop.f32.mrb[33].mxu0  ;;  %v2010_v4 = vld [vmem:[%s4597_s6] ss:$0 sm:$0xff] }
 0x503   :  { %v2410_v9 = vadd.f32 %v2409_v8, %v2408_v5  ;;  %v2371_v10 = vpop.f32.mrb[33].mxu1  ;;  %v1993_v8 = vld [vmem:[%s4590_s0] sm:$0xff] }
 0x504   :  { %v2372_v13 = vadd.f32 %v2371_v10, %v2370_v15  ;;  %v1996_v10 = vld [vmem:[%s4590_s0 + $0x18] sm:$0xff] }
 0x505   :  { %v2411_v14 = vpop.f32.mrb[34].mxu0  ;;  %v1687_v57 = vadd.f32 %v2410_v9, %v1602_v48  ;;  %v1994_v9 = vld [vmem:[%s4590_s0 + $0x8] sm:$0xff] }
 0x506   :  { %v1612_v53 = vadd.f32 %v2372_v13, %v1527_v43  ;;  %v2412_v17 = vpop.f32.mrb[35].mxu0 }
 0x507   :  { %v2413_v59 = vadd.f32 %v2412_v17, %v2411_v14 }
 0x509   :  { %v2414_v62 = vpop.f32.mrb[36].mxu0  ;;  %v1692_v11 = vadd.f32 %v2413_v59, %v1607_v7 }
 0x50a   :  { %v2415_v19 = vpop.f32.mrb[37].mxu0 }
 0x50b   :  { %v2416_v58 = vadd.f32 %v2415_v19, %v2414_v62 }
 0x50d   :  { %v1697_v60 = vadd.f32 %v2416_v58, %v1612_v53 }
 0x516   :  { %v2613_v12 = vpop.f32.mrb[34].mxu1 }
 0x517   :  { %v1772_v23 = vadd.f32 %v2613_v12, %v1687_v57  ;;  %v1766_v16 = vpop.f32.mrb[35].mxu1 }
 0x518   :  { %v1767_v1 = vadd.f32 %v1766_v16, %v1682_v6 }
 0x51a   :  { %v2616_v0 = vpop.f32.mrb[36].mxu1  ;;  %v1787_v28 = vadd.f32 %v1772_v23, %v1767_v1 }
 0x51b   :  { %v1782_v25 = vadd.f32 %v2616_v0, %v1697_v60  ;;  %v1776_v32 = vpop.f32.mrb[37].mxu1 }
 0x51c   :  { %v1777_v54 = vadd.f32 %v1776_v32, %v1692_v11 }
 0x51e   :  { %v1788_v35 = vadd.f32 %v1787_v28, %v1777_v54 }
 0x520   :  { %v1789_v2 = vadd.f32 %v1788_v35, %v1782_v25 }
 0x522   :  { %v1790_v29 = vrot.slane %v1789_v2, 4 }
 0x524   :  { %v1791_v20 = vadd.f32 %v1790_v29, %v1789_v2 }
 0x526   :  { %v1792_v3 = vrot.slane %v1791_v20, 2 }
 0x528   :  { %v1793_v18 = vadd.f32 %v1792_v3, %v1791_v20 }
 0x52a   :  { %v1794_v63 = vrot.slane %v1793_v18, 1 }
 0x52c   :  { %v1795_v21 = vadd.f32 %v1794_v63, %v1793_v18 }
 0x52e   :  { %2650 = vmatmul.mubr.f32.vlgmr.msra.gmra.mrb[38].mxu0 %v1795_v21 }
 0x601   :  { %v1878_v24 = vpop.f32.mrb[38].mxu0 }
 0x602   :  { %v1885_v56 = vrot.slane %v1878_v24, %v3865_v27  ;;  %v2651_v44 = vpop.f32.mrb[39].mxu0 }
 0x604   :  { %v1886_v30 = vsub.f32 %v1767_v1, %v1885_v56  ;;  %v1887_v31 = vsub.f32 %v1772_v23, %v1885_v56  ;;  %v1888_v26 = vsub.f32 %v1777_v54, %v1885_v56  ;;  %v1889_v33 = vsub.f32 %v1782_v25, %v1885_v56 }
 0x606   :  { %v1890_v55 = vmul.f32 %v1886_v30, %v1886_v30  ;;  %v1891_v38 = vmul.f32 %v1887_v31, %v1887_v31  ;;  %v1892_v39 = vmul.f32 %v1888_v26, %v1888_v26  ;;  %v1893_v34 = vmul.f32 %v1889_v33, %v1889_v33 }
 0x608   :  { %v1894_v61 = vadd.f32 %v1891_v38, %v1890_v55 }
 0x60a   :  { %v1895_v42 = vadd.f32 %v1894_v61, %v1892_v39 }
 0x60c   :  { %v1896_v43 = vadd.f32 %v1895_v42, %v1893_v34 }
 0x60e   :  { %v1897_v45 = vrot.slane %v1896_v43, 4 }
 0x610   :  { %v1898_v46 = vadd.f32 %v1897_v45, %v1896_v43 }
 0x612   :  { %v1899_v22 = vrot.slane %v1898_v46, 2 }
 0x614   :  { %v1900_v40 = vadd.f32 %v1899_v22, %v1898_v46 }
 0x616   :  { %v1901_v47 = vrot.slane %v1900_v40, 1 }
 0x618   :  { %v1902_v36 = vadd.f32 %v1901_v47, %v1900_v40 }
 0x61a   :  { %2685 = vmatmul.mubr.f32.vlgmr.msra.gmra.mrb[38].mxu1 %v1902_v36 }
 0x6ed   :  { %v1969_v37 = vpop.f32.mrb[38].mxu1 }
 0x6ee   :  { %v1970_v49 = vadd.f32 1e-05, %v1969_v37  ;;  %v2686_v48 = vpop.f32.mrb[39].mxu1 }
 0x6f0   :  { %3130 = vrsqrt.f32 %v1970_v49 }
 0x6fa   :  { %v3131_v41 = vpop.eup %3130 }
 0x6fb   :  { %v1974_v51 = vmul.f32 %v3131_v41, %v1785_v50 }
 0x6fd   :  { %v1978_v52 = vrot.slane %v1974_v51, %v3865_v27  ;;  %v1995_v27 = vld [vmem:[%s4590_s0 + $0x10] sm:$0xff] }
 0x6ff   :  { %v1979_v5 = vmul.f32 %v1978_v52, %v1886_v30  ;;  %v1980_v6 = vmul.f32 %v1978_v52, %v1887_v31  ;;  %v1981_v7 = vmul.f32 %v1978_v52, %v1888_v26  ;;  %v1982_v15 = vmul.f32 %v1978_v52, %v1889_v33 }
 0x701   :  { %v1989_v13 = vadd.f32 %v2010_v4, %v1979_v5  ;;  %v1990_v14 = vadd.f32 %v2010_v4, %v1980_v6  ;;  %v1991_v57 = vadd.f32 %v2010_v4, %v1981_v7  ;;  %v1992_v53 = vadd.f32 %v2010_v4, %v1982_v15 }
 0x703   :  { %v1997_v17 = vadd.f32 %v1993_v8, %v1989_v13  ;;  %v1998_v59 = vadd.f32 %v1994_v9, %v1990_v14  ;;  %v1999_v62 = vadd.f32 %v1995_v27, %v1991_v57  ;;  %v2000_v11 = vadd.f32 %v1996_v10, %v1992_v53 }
 0x705   :  { %2001 = vst [vmem:[%s4598_s8] sm:$0xff] %v1997_v17  ;;  %2002 = vst [vmem:[%s4598_s8 + $0x8] sm:$0xff] %v1998_v59 }
 0x706   :  { %2003 = vst [vmem:[%s4598_s8 + $0x10] sm:$0xff] %v1999_v62  ;;  %2004 = vst [vmem:[%s4598_s8 + $0x18] sm:$0xff] %v2000_v11 }

</bundles_post_ra>
